<compile_context>
chip_gen: v7x
topology: tpu7x:2x2x1
jax: 0.10.0
libtpu: 0.0.40
codegen_flags: <defaults>
</compile_context>

<pallas_src>
import jax
import jax.numpy as jnp
from jax import lax
from jax.experimental import pallas as pl
from jax.experimental.pallas import tpu as pltpu

EPS = 1e-5


def _step_config(feats_hidden, flows, blocks):
    """Static per-step (feats_block, drop_before_step) schedule."""
    feats_base = feats_hidden // blocks
    shift = flows // blocks
    cfg = []
    feats_block = feats_hidden
    for k in range(flows):
        drop = (k % shift == 0 and k > 0)
        if drop:
            feats_block = feats_block - feats_base
        cfg.append((feats_block, drop))
    return cfg, feats_base


def _make_fused_kernel(cfg, feats_base, feats_hidden, B, K):
    """One kernel that runs every flow step for the whole batch (lanes = B*K)."""
    flows = len(cfg)
    inv_k = 1.0 / float(K)

    def kernel(*refs):
        x_ref, h_ref, S_ref, ST_ref = refs[:4]
        step_refs = refs[4:4 + 8 * flows]
        y_ref, ld_ref = refs[4 + 8 * flows:4 + 8 * flows + 2]

        x = x_ref[...]            # (C0, B*K)   future_enc, batch folded in lanes
        h = h_ref[...]            # (Fh, B*K)   history_enc (conditioning)
        S = S_ref[...]            # (B*K, B)    lane -> sample summation matrix
        ST = ST_ref[...]          # (B, B*K)    sample -> lane broadcast matrix

        ld = jnp.zeros((1, B), jnp.float32)   # per-sample log-det accumulator
        out_off = 0

        for k in range(flows):
            nw = step_refs[8 * k + 0][...]    # (Cb, 1)
            nb = step_refs[8 * k + 1][...]    # (Cb, 1)
            A = step_refs[8 * k + 2][...]     # (Cb, Cb)  group-average matrix
            w1a = step_refs[8 * k + 3][...]   # (H, half)
            w1h = step_refs[8 * k + 4][...]   # (H, Fh)
            b1 = step_refs[8 * k + 5][...]    # (H, 1)
            w2 = step_refs[8 * k + 6][...]    # (Cb, H)
            b2 = step_refs[8 * k + 7][...]    # (Cb, 1)

            Cb, drop = cfg[k]
            if drop:
                # emit the first feats_base channels unchanged to Z
                y_ref[out_off:out_off + feats_base, :] = x[:feats_base, :]
                out_off += feats_base
                x = x[feats_base:, :]
            half = Cb // 2

            # ---------------- GroupInstanceNorm (two-pass) ----------------
            sum_x = jnp.dot(x, S, preferred_element_type=jnp.float32)        # (Cb, B)
            mean_cb = jnp.dot(A, sum_x,
                              preferred_element_type=jnp.float32) * inv_k    # (Cb, B)
            mean_l = jnp.dot(mean_cb, ST,
                             preferred_element_type=jnp.float32)             # (Cb, B*K)
            xc = x - mean_l
            sum_sq = jnp.dot(xc * xc, S, preferred_element_type=jnp.float32)  # (Cb, B)
            var_cb = jnp.dot(A, sum_sq,
                             preferred_element_type=jnp.float32) * inv_k      # (Cb, B)
            inv_std_l = jnp.dot(lax.rsqrt(var_cb + EPS), ST,
                                preferred_element_type=jnp.float32)           # (Cb, B*K)
            xn = xc * inv_std_l * nw + nb

            # log_det_n / K  (the +sum_c log|nw_c| term is hoisted to wrapper)
            ld = ld - 0.5 * jnp.sum(jnp.log(var_cb + EPS), axis=0, keepdims=True)

            # ---------------- Affinecoupling ----------------
            x_a = xn[:half, :]                                                # (half, B*K)
            x_b = xn[half:, :]
            h1 = (jnp.dot(w1a, x_a, preferred_element_type=jnp.float32)
                  + jnp.dot(w1h, h, preferred_element_type=jnp.float32) + b1)  # (H, B*K)
            h1 = jnp.maximum(h1, 0.0)
            out = jnp.dot(w2, h1, preferred_element_type=jnp.float32) + b2     # (Cb, B*K)

            z = out[:half, :] + 2.0
            t = out[half:, :]
            # stable log-sigmoid: log s = -softplus(-z)
            log_s = -(jnp.maximum(-z, 0.0) + jnp.log(1.0 + jnp.exp(-jnp.abs(z))))
            s = jnp.exp(log_s)
            y_b = (x_b + t) * s

            # per-sample coupling log-det: sum over channels then per-sample lanes
            ld = ld + jnp.dot(jnp.sum(log_s, axis=0, keepdims=True), S,
                              preferred_element_type=jnp.float32)             # (1, B)

            x = jnp.concatenate([x_a, y_b], axis=0)                            # (Cb, B*K)

        y_ref[out_off:, :] = x
        ld_ref[...] = ld

    return kernel


def init_params(key, feats_hidden, flows, blocks, group_len=4):
    """Deterministic synthetic parameters matching the module's __init__ shapes."""
    cfg, _ = _step_config(feats_hidden, flows, blocks)
    params = []
    H = feats_hidden
    for k in range(flows):
        feats_block = cfg[k][0]
        half = feats_block // 2
        cin = half + feats_hidden
        key, k1, k2, k3, k4 = jax.random.split(key, 5)

        gid = jnp.arange(feats_block) // group_len
        A = (gid[:, None] == gid[None, :]).astype(jnp.float32) / group_len

        params.append(dict(
            nw=(1.0 + 0.1 * jax.random.normal(k1, (feats_block, 1))).astype(jnp.float32),
            nb=(0.1 * jax.random.normal(k2, (feats_block, 1))).astype(jnp.float32),
            A=A,
            w1=(0.1 * jax.random.normal(k3, (H, cin))).astype(jnp.float32),
            b1=jnp.zeros((H, 1), jnp.float32),
            w2=(0.1 * jax.random.normal(k4, (feats_block, H))).astype(jnp.float32),
            b2=jnp.zeros((feats_block, 1), jnp.float32),
        ))
    return params


def flow_aff_ins_forward(future_enc, history_enc, params, *,
                         flows, blocks, feats_hidden, group_len=4):
    """Mirrors Flow_aff_ins.forward -> (Z, log_det). self.K == history_enc.shape[-1]."""
    B, C, K = future_enc.shape
    Fh = history_enc.shape[1]
    cfg, feats_base = _step_config(feats_hidden, flows, blocks)

    # TODO(synk): `z_his = torch.randn(B, F, K)` in the PyTorch forward is created
    # but never used; omitted here.

    # ---- lane-dense layout: fold batch onto the lane axis -> (C, B*K) ----
    x_lanes = jnp.transpose(future_enc, (1, 0, 2)).reshape(C, B * K)
    h_lanes = jnp.transpose(history_enc, (1, 0, 2)).reshape(Fh, B * K)

    # lane <-> sample summation / broadcast matrices
    S = (jnp.arange(B * K)[:, None] // K == jnp.arange(B)[None, :]).astype(jnp.float32)
    ST = S.T

    # flatten per-step params; split w1 into (x_a | history) halves to avoid concat
    flat = []
    hoisted_const = jnp.float32(0.0)   # sum_k sum_c log|nw_c|  (batch-invariant)
    for k in range(flows):
        p = params[k]
        half = cfg[k][0] // 2
        flat.extend([p["nw"], p["nb"], p["A"],
                     p["w1"][:, :half], p["w1"][:, half:],
                     p["b1"], p["w2"], p["b2"]])
        hoisted_const = hoisted_const + jnp.sum(jnp.log(jnp.abs(p["nw"])))

    kernel = _make_fused_kernel(cfg, feats_base, feats_hidden, B, K)
    n_in = 4 + 8 * flows
    vmem_spec = pl.BlockSpec(memory_space=pltpu.MemorySpace.VMEM)

    y_lanes, ld = pl.pallas_call(
        kernel,
        in_specs=[vmem_spec] * n_in,
        out_specs=(vmem_spec, vmem_spec),
        out_shape=(
            jax.ShapeDtypeStruct((feats_hidden, B * K), jnp.float32),
            jax.ShapeDtypeStruct((1, B), jnp.float32),
        ),
    )(x_lanes, h_lanes, S, ST, *flat)

    Z = jnp.transpose(y_lanes.reshape(feats_hidden, B, K), (1, 0, 2))
    log_det = ld[0] + hoisted_const
    return Z, log_det


if __name__ == "__main__":
    # Small config consistent with the module:
    #   feats_hidden=32, blocks=2, flows=4 -> feats_base=16, shift=2, K=8, B=2.
    B, feats_hidden, K = 2, 32, 8
    flows, blocks, group_len = 4, 2, 4

    key = jax.random.PRNGKey(0)
    kf, kh, kp = jax.random.split(key, 3)
    future_enc = jax.random.normal(kf, (B, feats_hidden, K), dtype=jnp.float32)
    history_enc = jax.random.normal(kh, (B, feats_hidden, K), dtype=jnp.float32)
    params = init_params(kp, feats_hidden, flows, blocks, group_len)

    Z, log_det = flow_aff_ins_forward(
        future_enc, history_enc, params,
        flows=flows, blocks=blocks, feats_hidden=feats_hidden, group_len=group_len)
    jax.block_until_ready((Z, log_det))

    assert Z.shape == (B, feats_hidden, K), Z.shape
    assert log_det.shape == (B,), log_det.shape
    assert bool(jnp.all(jnp.isfinite(Z))) and bool(jnp.all(jnp.isfinite(log_det)))
    print("KERNEL_OK")
</pallas_src>

<mosaic_0001>
module attributes {stable_mosaic.version = 11 : i64} {
  func.func @kernel(%arg0: memref<32x16xf32, #tpu.memory_space<vmem>>, %arg1: memref<32x16xf32, #tpu.memory_space<vmem>>, %arg2: memref<16x2xf32, #tpu.memory_space<vmem>>, %arg3: memref<2x16xf32, #tpu.memory_space<vmem>>, %arg4: memref<32x1xf32, #tpu.memory_space<vmem>>, %arg5: memref<32x1xf32, #tpu.memory_space<vmem>>, %arg6: memref<32x32xf32, #tpu.memory_space<vmem>>, %arg7: memref<32x16xf32, #tpu.memory_space<vmem>>, %arg8: memref<32x32xf32, #tpu.memory_space<vmem>>, %arg9: memref<32x1xf32, #tpu.memory_space<vmem>>, %arg10: memref<32x32xf32, #tpu.memory_space<vmem>>, %arg11: memref<32x1xf32, #tpu.memory_space<vmem>>, %arg12: memref<32x1xf32, #tpu.memory_space<vmem>>, %arg13: memref<32x1xf32, #tpu.memory_space<vmem>>, %arg14: memref<32x32xf32, #tpu.memory_space<vmem>>, %arg15: memref<32x16xf32, #tpu.memory_space<vmem>>, %arg16: memref<32x32xf32, #tpu.memory_space<vmem>>, %arg17: memref<32x1xf32, #tpu.memory_space<vmem>>, %arg18: memref<32x32xf32, #tpu.memory_space<vmem>>, %arg19: memref<32x1xf32, #tpu.memory_space<vmem>>, %arg20: memref<16x1xf32, #tpu.memory_space<vmem>>, %arg21: memref<16x1xf32, #tpu.memory_space<vmem>>, %arg22: memref<16x16xf32, #tpu.memory_space<vmem>>, %arg23: memref<32x8xf32, #tpu.memory_space<vmem>>, %arg24: memref<32x32xf32, #tpu.memory_space<vmem>>, %arg25: memref<32x1xf32, #tpu.memory_space<vmem>>, %arg26: memref<16x32xf32, #tpu.memory_space<vmem>>, %arg27: memref<16x1xf32, #tpu.memory_space<vmem>>, %arg28: memref<16x1xf32, #tpu.memory_space<vmem>>, %arg29: memref<16x1xf32, #tpu.memory_space<vmem>>, %arg30: memref<16x16xf32, #tpu.memory_space<vmem>>, %arg31: memref<32x8xf32, #tpu.memory_space<vmem>>, %arg32: memref<32x32xf32, #tpu.memory_space<vmem>>, %arg33: memref<32x1xf32, #tpu.memory_space<vmem>>, %arg34: memref<16x32xf32, #tpu.memory_space<vmem>>, %arg35: memref<16x1xf32, #tpu.memory_space<vmem>>, %arg36: memref<32x16xf32, #tpu.memory_space<vmem>>, %arg37: memref<1x2xf32, #tpu.memory_space<vmem>>) attributes {dimension_semantics = [], scalar_prefetch = 0 : i64, scratch_operands = 0 : i64, tpu.core_type = #tpu.core_type<tc>} {
    %c0 = arith.constant 0 : index
    %c0_0 = arith.constant 0 : index
    %0 = vector.load %arg0[%c0, %c0_0] : memref<32x16xf32, #tpu.memory_space<vmem>>, vector<32x16xf32>
    %c0_1 = arith.constant 0 : index
    %c0_2 = arith.constant 0 : index
    %1 = vector.load %arg1[%c0_1, %c0_2] : memref<32x16xf32, #tpu.memory_space<vmem>>, vector<32x16xf32>
    %c0_3 = arith.constant 0 : index
    %c0_4 = arith.constant 0 : index
    %2 = vector.load %arg2[%c0_3, %c0_4] : memref<16x2xf32, #tpu.memory_space<vmem>>, vector<16x2xf32>
    %c0_5 = arith.constant 0 : index
    %c0_6 = arith.constant 0 : index
    %3 = vector.load %arg3[%c0_5, %c0_6] : memref<2x16xf32, #tpu.memory_space<vmem>>, vector<2x16xf32>
    %cst = arith.constant 0.000000e+00 : f32
    %4 = vector.broadcast %cst : f32 to vector<1x2xf32>
    %c0_7 = arith.constant 0 : index
    %c0_8 = arith.constant 0 : index
    %5 = vector.load %arg4[%c0_7, %c0_8] : memref<32x1xf32, #tpu.memory_space<vmem>>, vector<32x1xf32>
    %c0_9 = arith.constant 0 : index
    %c0_10 = arith.constant 0 : index
    %6 = vector.load %arg5[%c0_9, %c0_10] : memref<32x1xf32, #tpu.memory_space<vmem>>, vector<32x1xf32>
    %c0_11 = arith.constant 0 : index
    %c0_12 = arith.constant 0 : index
    %7 = vector.load %arg6[%c0_11, %c0_12] : memref<32x32xf32, #tpu.memory_space<vmem>>, vector<32x32xf32>
    %c0_13 = arith.constant 0 : index
    %c0_14 = arith.constant 0 : index
    %8 = vector.load %arg7[%c0_13, %c0_14] : memref<32x16xf32, #tpu.memory_space<vmem>>, vector<32x16xf32>
    %c0_15 = arith.constant 0 : index
    %c0_16 = arith.constant 0 : index
    %9 = vector.load %arg8[%c0_15, %c0_16] : memref<32x32xf32, #tpu.memory_space<vmem>>, vector<32x32xf32>
    %c0_17 = arith.constant 0 : index
    %c0_18 = arith.constant 0 : index
    %10 = vector.load %arg9[%c0_17, %c0_18] : memref<32x1xf32, #tpu.memory_space<vmem>>, vector<32x1xf32>
    %c0_19 = arith.constant 0 : index
    %c0_20 = arith.constant 0 : index
    %11 = vector.load %arg10[%c0_19, %c0_20] : memref<32x32xf32, #tpu.memory_space<vmem>>, vector<32x32xf32>
    %c0_21 = arith.constant 0 : index
    %c0_22 = arith.constant 0 : index
    %12 = vector.load %arg11[%c0_21, %c0_22] : memref<32x1xf32, #tpu.memory_space<vmem>>, vector<32x1xf32>
    %cst_23 = arith.constant dense<0.000000e+00> : vector<32x2xf32>
    %13 = tpu.matmul %0, %2, %cst_23 {dimension_numbers = #tpu.dot_dimension_numbers<[1], [0], [0], [1], [0, 0, 1, 1], [], []>} : vector<32x16xf32>, vector<16x2xf32>, vector<32x2xf32> -> vector<32x2xf32>
    %cst_24 = arith.constant dense<0.000000e+00> : vector<32x2xf32>
    %14 = tpu.matmul %7, %13, %cst_24 {dimension_numbers = #tpu.dot_dimension_numbers<[1], [0], [0], [1], [0, 0, 1, 1], [], []>} : vector<32x32xf32>, vector<32x2xf32>, vector<32x2xf32> -> vector<32x2xf32>
    %cst_25 = arith.constant 1.250000e-01 : f32
    %15 = vector.broadcast %cst_25 : f32 to vector<32x2xf32>
    %16 = arith.mulf %14, %15 : vector<32x2xf32>
    %cst_26 = arith.constant dense<0.000000e+00> : vector<32x16xf32>
    %17 = tpu.matmul %16, %3, %cst_26 {dimension_numbers = #tpu.dot_dimension_numbers<[1], [0], [0], [1], [0, 0, 1, 1], [], []>} : vector<32x2xf32>, vector<2x16xf32>, vector<32x16xf32> -> vector<32x16xf32>
    %18 = arith.subf %0, %17 : vector<32x16xf32>
    %19 = arith.mulf %18, %18 : vector<32x16xf32>
    %cst_27 = arith.constant dense<0.000000e+00> : vector<32x2xf32>
    %20 = tpu.matmul %19, %2, %cst_27 {dimension_numbers = #tpu.dot_dimension_numbers<[1], [0], [0], [1], [0, 0, 1, 1], [], []>} : vector<32x16xf32>, vector<16x2xf32>, vector<32x2xf32> -> vector<32x2xf32>
    %cst_28 = arith.constant dense<0.000000e+00> : vector<32x2xf32>
    %21 = tpu.matmul %7, %20, %cst_28 {dimension_numbers = #tpu.dot_dimension_numbers<[1], [0], [0], [1], [0, 0, 1, 1], [], []>} : vector<32x32xf32>, vector<32x2xf32>, vector<32x2xf32> -> vector<32x2xf32>
    %cst_29 = arith.constant 1.250000e-01 : f32
    %22 = vector.broadcast %cst_29 : f32 to vector<32x2xf32>
    %23 = arith.mulf %21, %22 : vector<32x2xf32>
    %cst_30 = arith.constant 9.99999974E-6 : f32
    %24 = vector.broadcast %cst_30 : f32 to vector<32x2xf32>
    %25 = arith.addf %23, %24 : vector<32x2xf32>
    %26 = math.rsqrt %25 : vector<32x2xf32>
    %cst_31 = arith.constant dense<0.000000e+00> : vector<32x16xf32>
    %27 = tpu.matmul %26, %3, %cst_31 {dimension_numbers = #tpu.dot_dimension_numbers<[1], [0], [0], [1], [0, 0, 1, 1], [], []>} : vector<32x2xf32>, vector<2x16xf32>, vector<32x16xf32> -> vector<32x16xf32>
    %28 = arith.mulf %18, %27 : vector<32x16xf32>
    %29 = vector.broadcast %5 : vector<32x1xf32> to vector<32x16xf32>
    %30 = arith.mulf %28, %29 : vector<32x16xf32>
    %31 = vector.broadcast %6 : vector<32x1xf32> to vector<32x16xf32>
    %32 = arith.addf %30, %31 : vector<32x16xf32>
    %cst_32 = arith.constant 9.99999974E-6 : f32
    %33 = vector.broadcast %cst_32 : f32 to vector<32x2xf32>
    %34 = arith.addf %23, %33 : vector<32x2xf32>
    %35 = math.log %34 : vector<32x2xf32>
    %cst_33 = arith.constant dense<0.000000e+00> : vector<2xf32>
    %36 = vector.multi_reduction <add>, %35, %cst_33 [0] : vector<32x2xf32> to vector<2xf32>
    %37 = vector.shape_cast %36 : vector<2xf32> to vector<1x2xf32>
    %cst_34 = arith.constant 5.000000e-01 : f32
    %38 = vector.broadcast %cst_34 : f32 to vector<1x2xf32>
    %39 = arith.mulf %38, %37 : vector<1x2xf32>
    %40 = arith.subf %4, %39 : vector<1x2xf32>
    %41 = vector.extract_strided_slice %32 {offsets = [0, 0], sizes = [16, 16], strides = [1, 1]} : vector<32x16xf32> to vector<16x16xf32>
    %42 = vector.extract_strided_slice %32 {offsets = [16, 0], sizes = [16, 16], strides = [1, 1]} : vector<32x16xf32> to vector<16x16xf32>
    %cst_35 = arith.constant dense<0.000000e+00> : vector<32x16xf32>
    %43 = tpu.matmul %8, %41, %cst_35 {dimension_numbers = #tpu.dot_dimension_numbers<[1], [0], [0], [1], [0, 0, 1, 1], [], []>} : vector<32x16xf32>, vector<16x16xf32>, vector<32x16xf32> -> vector<32x16xf32>
    %cst_36 = arith.constant dense<0.000000e+00> : vector<32x16xf32>
    %44 = tpu.matmul %9, %1, %cst_36 {dimension_numbers = #tpu.dot_dimension_numbers<[1], [0], [0], [1], [0, 0, 1, 1], [], []>} : vector<32x32xf32>, vector<32x16xf32>, vector<32x16xf32> -> vector<32x16xf32>
    %45 = arith.addf %43, %44 : vector<32x16xf32>
    %46 = vector.broadcast %10 : vector<32x1xf32> to vector<32x16xf32>
    %47 = arith.addf %45, %46 : vector<32x16xf32>
    %cst_37 = arith.constant 0.000000e+00 : f32
    %48 = vector.broadcast %cst_37 : f32 to vector<32x16xf32>
    %49 = arith.maximumf %47, %48 : vector<32x16xf32>
    %cst_38 = arith.constant dense<0.000000e+00> : vector<32x16xf32>
    %50 = tpu.matmul %11, %49, %cst_38 {dimension_numbers = #tpu.dot_dimension_numbers<[1], [0], [0], [1], [0, 0, 1, 1], [], []>} : vector<32x32xf32>, vector<32x16xf32>, vector<32x16xf32> -> vector<32x16xf32>
    %51 = vector.broadcast %12 : vector<32x1xf32> to vector<32x16xf32>
    %52 = arith.addf %50, %51 : vector<32x16xf32>
    %53 = vector.extract_strided_slice %52 {offsets = [0, 0], sizes = [16, 16], strides = [1, 1]} : vector<32x16xf32> to vector<16x16xf32>
    %cst_39 = arith.constant 2.000000e+00 : f32
    %54 = vector.broadcast %cst_39 : f32 to vector<16x16xf32>
    %55 = arith.addf %53, %54 : vector<16x16xf32>
    %56 = vector.extract_strided_slice %52 {offsets = [16, 0], sizes = [16, 16], strides = [1, 1]} : vector<32x16xf32> to vector<16x16xf32>
    %cst_40 = arith.constant 0.000000e+00 : f32
    %57 = vector.broadcast %cst_40 : f32 to vector<16x16xf32>
    %58 = arith.subf %57, %55 : vector<16x16xf32>
    %cst_41 = arith.constant 0.000000e+00 : f32
    %59 = vector.broadcast %cst_41 : f32 to vector<16x16xf32>
    %60 = arith.maximumf %58, %59 : vector<16x16xf32>
    %61 = math.absf %55 : vector<16x16xf32>
    %cst_42 = arith.constant 0.000000e+00 : f32
    %62 = vector.broadcast %cst_42 : f32 to vector<16x16xf32>
    %63 = arith.subf %62, %61 : vector<16x16xf32>
    %64 = math.exp %63 : vector<16x16xf32>
    %cst_43 = arith.constant 1.000000e+00 : f32
    %65 = vector.broadcast %cst_43 : f32 to vector<16x16xf32>
    %66 = arith.addf %65, %64 : vector<16x16xf32>
    %67 = math.log %66 : vector<16x16xf32>
    %68 = arith.addf %60, %67 : vector<16x16xf32>
    %cst_44 = arith.constant 0.000000e+00 : f32
    %69 = vector.broadcast %cst_44 : f32 to vector<16x16xf32>
    %70 = arith.subf %69, %68 : vector<16x16xf32>
    %71 = math.exp %70 : vector<16x16xf32>
    %72 = arith.addf %42, %56 : vector<16x16xf32>
    %73 = arith.mulf %72, %71 : vector<16x16xf32>
    %cst_45 = arith.constant dense<0.000000e+00> : vector<16xf32>
    %74 = vector.multi_reduction <add>, %70, %cst_45 [0] : vector<16x16xf32> to vector<16xf32>
    %75 = vector.shape_cast %74 : vector<16xf32> to vector<1x16xf32>
    %cst_46 = arith.constant dense<0.000000e+00> : vector<1x2xf32>
    %76 = tpu.matmul %75, %2, %cst_46 {dimension_numbers = #tpu.dot_dimension_numbers<[1], [0], [0], [1], [0, 0, 1, 1], [], []>} : vector<1x16xf32>, vector<16x2xf32>, vector<1x2xf32> -> vector<1x2xf32>
    %77 = arith.addf %40, %76 : vector<1x2xf32>
    %78 = tpu.concatenate %41, %73 in 0 : vector<16x16xf32>, vector<16x16xf32> -> vector<32x16xf32>
    %c0_47 = arith.constant 0 : index
    %c0_48 = arith.constant 0 : index
    %79 = vector.load %arg12[%c0_47, %c0_48] : memref<32x1xf32, #tpu.memory_space<vmem>>, vector<32x1xf32>
    %c0_49 = arith.constant 0 : index
    %c0_50 = arith.constant 0 : index
    %80 = vector.load %arg13[%c0_49, %c0_50] : memref<32x1xf32, #tpu.memory_space<vmem>>, vector<32x1xf32>
    %c0_51 = arith.constant 0 : index
    %c0_52 = arith.constant 0 : index
    %81 = vector.load %arg14[%c0_51, %c0_52] : memref<32x32xf32, #tpu.memory_space<vmem>>, vector<32x32xf32>
    %c0_53 = arith.constant 0 : index
    %c0_54 = arith.constant 0 : index
    %82 = vector.load %arg15[%c0_53, %c0_54] : memref<32x16xf32, #tpu.memory_space<vmem>>, vector<32x16xf32>
    %c0_55 = arith.constant 0 : index
    %c0_56 = arith.constant 0 : index
    %83 = vector.load %arg16[%c0_55, %c0_56] : memref<32x32xf32, #tpu.memory_space<vmem>>, vector<32x32xf32>
    %c0_57 = arith.constant 0 : index
    %c0_58 = arith.constant 0 : index
    %84 = vector.load %arg17[%c0_57, %c0_58] : memref<32x1xf32, #tpu.memory_space<vmem>>, vector<32x1xf32>
    %c0_59 = arith.constant 0 : index
    %c0_60 = arith.constant 0 : index
    %85 = vector.load %arg18[%c0_59, %c0_60] : memref<32x32xf32, #tpu.memory_space<vmem>>, vector<32x32xf32>
    %c0_61 = arith.constant 0 : index
    %c0_62 = arith.constant 0 : index
    %86 = vector.load %arg19[%c0_61, %c0_62] : memref<32x1xf32, #tpu.memory_space<vmem>>, vector<32x1xf32>
    %cst_63 = arith.constant dense<0.000000e+00> : vector<32x2xf32>
    %87 = tpu.matmul %78, %2, %cst_63 {dimension_numbers = #tpu.dot_dimension_numbers<[1], [0], [0], [1], [0, 0, 1, 1], [], []>} : vector<32x16xf32>, vector<16x2xf32>, vector<32x2xf32> -> vector<32x2xf32>
    %cst_64 = arith.constant dense<0.000000e+00> : vector<32x2xf32>
    %88 = tpu.matmul %81, %87, %cst_64 {dimension_numbers = #tpu.dot_dimension_numbers<[1], [0], [0], [1], [0, 0, 1, 1], [], []>} : vector<32x32xf32>, vector<32x2xf32>, vector<32x2xf32> -> vector<32x2xf32>
    %cst_65 = arith.constant 1.250000e-01 : f32
    %89 = vector.broadcast %cst_65 : f32 to vector<32x2xf32>
    %90 = arith.mulf %88, %89 : vector<32x2xf32>
    %cst_66 = arith.constant dense<0.000000e+00> : vector<32x16xf32>
    %91 = tpu.matmul %90, %3, %cst_66 {dimension_numbers = #tpu.dot_dimension_numbers<[1], [0], [0], [1], [0, 0, 1, 1], [], []>} : vector<32x2xf32>, vector<2x16xf32>, vector<32x16xf32> -> vector<32x16xf32>
    %92 = arith.subf %78, %91 : vector<32x16xf32>
    %93 = arith.mulf %92, %92 : vector<32x16xf32>
    %cst_67 = arith.constant dense<0.000000e+00> : vector<32x2xf32>
    %94 = tpu.matmul %93, %2, %cst_67 {dimension_numbers = #tpu.dot_dimension_numbers<[1], [0], [0], [1], [0, 0, 1, 1], [], []>} : vector<32x16xf32>, vector<16x2xf32>, vector<32x2xf32> -> vector<32x2xf32>
    %cst_68 = arith.constant dense<0.000000e+00> : vector<32x2xf32>
    %95 = tpu.matmul %81, %94, %cst_68 {dimension_numbers = #tpu.dot_dimension_numbers<[1], [0], [0], [1], [0, 0, 1, 1], [], []>} : vector<32x32xf32>, vector<32x2xf32>, vector<32x2xf32> -> vector<32x2xf32>
    %cst_69 = arith.constant 1.250000e-01 : f32
    %96 = vector.broadcast %cst_69 : f32 to vector<32x2xf32>
    %97 = arith.mulf %95, %96 : vector<32x2xf32>
    %cst_70 = arith.constant 9.99999974E-6 : f32
    %98 = vector.broadcast %cst_70 : f32 to vector<32x2xf32>
    %99 = arith.addf %97, %98 : vector<32x2xf32>
    %100 = math.rsqrt %99 : vector<32x2xf32>
    %cst_71 = arith.constant dense<0.000000e+00> : vector<32x16xf32>
    %101 = tpu.matmul %100, %3, %cst_71 {dimension_numbers = #tpu.dot_dimension_numbers<[1], [0], [0], [1], [0, 0, 1, 1], [], []>} : vector<32x2xf32>, vector<2x16xf32>, vector<32x16xf32> -> vector<32x16xf32>
    %102 = arith.mulf %92, %101 : vector<32x16xf32>
    %103 = vector.broadcast %79 : vector<32x1xf32> to vector<32x16xf32>
    %104 = arith.mulf %102, %103 : vector<32x16xf32>
    %105 = vector.broadcast %80 : vector<32x1xf32> to vector<32x16xf32>
    %106 = arith.addf %104, %105 : vector<32x16xf32>
    %cst_72 = arith.constant 9.99999974E-6 : f32
    %107 = vector.broadcast %cst_72 : f32 to vector<32x2xf32>
    %108 = arith.addf %97, %107 : vector<32x2xf32>
    %109 = math.log %108 : vector<32x2xf32>
    %cst_73 = arith.constant dense<0.000000e+00> : vector<2xf32>
    %110 = vector.multi_reduction <add>, %109, %cst_73 [0] : vector<32x2xf32> to vector<2xf32>
    %111 = vector.shape_cast %110 : vector<2xf32> to vector<1x2xf32>
    %cst_74 = arith.constant 5.000000e-01 : f32
    %112 = vector.broadcast %cst_74 : f32 to vector<1x2xf32>
    %113 = arith.mulf %112, %111 : vector<1x2xf32>
    %114 = arith.subf %77, %113 : vector<1x2xf32>
    %115 = vector.extract_strided_slice %106 {offsets = [0, 0], sizes = [16, 16], strides = [1, 1]} : vector<32x16xf32> to vector<16x16xf32>
    %116 = vector.extract_strided_slice %106 {offsets = [16, 0], sizes = [16, 16], strides = [1, 1]} : vector<32x16xf32> to vector<16x16xf32>
    %cst_75 = arith.constant dense<0.000000e+00> : vector<32x16xf32>
    %117 = tpu.matmul %82, %115, %cst_75 {dimension_numbers = #tpu.dot_dimension_numbers<[1], [0], [0], [1], [0, 0, 1, 1], [], []>} : vector<32x16xf32>, vector<16x16xf32>, vector<32x16xf32> -> vector<32x16xf32>
    %cst_76 = arith.constant dense<0.000000e+00> : vector<32x16xf32>
    %118 = tpu.matmul %83, %1, %cst_76 {dimension_numbers = #tpu.dot_dimension_numbers<[1], [0], [0], [1], [0, 0, 1, 1], [], []>} : vector<32x32xf32>, vector<32x16xf32>, vector<32x16xf32> -> vector<32x16xf32>
    %119 = arith.addf %117, %118 : vector<32x16xf32>
    %120 = vector.broadcast %84 : vector<32x1xf32> to vector<32x16xf32>
    %121 = arith.addf %119, %120 : vector<32x16xf32>
    %cst_77 = arith.constant 0.000000e+00 : f32
    %122 = vector.broadcast %cst_77 : f32 to vector<32x16xf32>
    %123 = arith.maximumf %121, %122 : vector<32x16xf32>
    %cst_78 = arith.constant dense<0.000000e+00> : vector<32x16xf32>
    %124 = tpu.matmul %85, %123, %cst_78 {dimension_numbers = #tpu.dot_dimension_numbers<[1], [0], [0], [1], [0, 0, 1, 1], [], []>} : vector<32x32xf32>, vector<32x16xf32>, vector<32x16xf32> -> vector<32x16xf32>
    %125 = vector.broadcast %86 : vector<32x1xf32> to vector<32x16xf32>
    %126 = arith.addf %124, %125 : vector<32x16xf32>
    %127 = vector.extract_strided_slice %126 {offsets = [0, 0], sizes = [16, 16], strides = [1, 1]} : vector<32x16xf32> to vector<16x16xf32>
    %cst_79 = arith.constant 2.000000e+00 : f32
    %128 = vector.broadcast %cst_79 : f32 to vector<16x16xf32>
    %129 = arith.addf %127, %128 : vector<16x16xf32>
    %130 = vector.extract_strided_slice %126 {offsets = [16, 0], sizes = [16, 16], strides = [1, 1]} : vector<32x16xf32> to vector<16x16xf32>
    %cst_80 = arith.constant 0.000000e+00 : f32
    %131 = vector.broadcast %cst_80 : f32 to vector<16x16xf32>
    %132 = arith.subf %131, %129 : vector<16x16xf32>
    %cst_81 = arith.constant 0.000000e+00 : f32
    %133 = vector.broadcast %cst_81 : f32 to vector<16x16xf32>
    %134 = arith.maximumf %132, %133 : vector<16x16xf32>
    %135 = math.absf %129 : vector<16x16xf32>
    %cst_82 = arith.constant 0.000000e+00 : f32
    %136 = vector.broadcast %cst_82 : f32 to vector<16x16xf32>
    %137 = arith.subf %136, %135 : vector<16x16xf32>
    %138 = math.exp %137 : vector<16x16xf32>
    %cst_83 = arith.constant 1.000000e+00 : f32
    %139 = vector.broadcast %cst_83 : f32 to vector<16x16xf32>
    %140 = arith.addf %139, %138 : vector<16x16xf32>
    %141 = math.log %140 : vector<16x16xf32>
    %142 = arith.addf %134, %141 : vector<16x16xf32>
    %cst_84 = arith.constant 0.000000e+00 : f32
    %143 = vector.broadcast %cst_84 : f32 to vector<16x16xf32>
    %144 = arith.subf %143, %142 : vector<16x16xf32>
    %145 = math.exp %144 : vector<16x16xf32>
    %146 = arith.addf %116, %130 : vector<16x16xf32>
    %147 = arith.mulf %146, %145 : vector<16x16xf32>
    %cst_85 = arith.constant dense<0.000000e+00> : vector<16xf32>
    %148 = vector.multi_reduction <add>, %144, %cst_85 [0] : vector<16x16xf32> to vector<16xf32>
    %149 = vector.shape_cast %148 : vector<16xf32> to vector<1x16xf32>
    %cst_86 = arith.constant dense<0.000000e+00> : vector<1x2xf32>
    %150 = tpu.matmul %149, %2, %cst_86 {dimension_numbers = #tpu.dot_dimension_numbers<[1], [0], [0], [1], [0, 0, 1, 1], [], []>} : vector<1x16xf32>, vector<16x2xf32>, vector<1x2xf32> -> vector<1x2xf32>
    %151 = arith.addf %114, %150 : vector<1x2xf32>
    %152 = tpu.concatenate %115, %147 in 0 : vector<16x16xf32>, vector<16x16xf32> -> vector<32x16xf32>
    %c0_87 = arith.constant 0 : index
    %c0_88 = arith.constant 0 : index
    %153 = vector.load %arg20[%c0_87, %c0_88] : memref<16x1xf32, #tpu.memory_space<vmem>>, vector<16x1xf32>
    %c0_89 = arith.constant 0 : index
    %c0_90 = arith.constant 0 : index
    %154 = vector.load %arg21[%c0_89, %c0_90] : memref<16x1xf32, #tpu.memory_space<vmem>>, vector<16x1xf32>
    %c0_91 = arith.constant 0 : index
    %c0_92 = arith.constant 0 : index
    %155 = vector.load %arg22[%c0_91, %c0_92] : memref<16x16xf32, #tpu.memory_space<vmem>>, vector<16x16xf32>
    %c0_93 = arith.constant 0 : index
    %c0_94 = arith.constant 0 : index
    %156 = vector.load %arg23[%c0_93, %c0_94] : memref<32x8xf32, #tpu.memory_space<vmem>>, vector<32x8xf32>
    %c0_95 = arith.constant 0 : index
    %c0_96 = arith.constant 0 : index
    %157 = vector.load %arg24[%c0_95, %c0_96] : memref<32x32xf32, #tpu.memory_space<vmem>>, vector<32x32xf32>
    %c0_97 = arith.constant 0 : index
    %c0_98 = arith.constant 0 : index
    %158 = vector.load %arg25[%c0_97, %c0_98] : memref<32x1xf32, #tpu.memory_space<vmem>>, vector<32x1xf32>
    %c0_99 = arith.constant 0 : index
    %c0_100 = arith.constant 0 : index
    %159 = vector.load %arg26[%c0_99, %c0_100] : memref<16x32xf32, #tpu.memory_space<vmem>>, vector<16x32xf32>
    %c0_101 = arith.constant 0 : index
    %c0_102 = arith.constant 0 : index
    %160 = vector.load %arg27[%c0_101, %c0_102] : memref<16x1xf32, #tpu.memory_space<vmem>>, vector<16x1xf32>
    %161 = vector.extract_strided_slice %152 {offsets = [0, 0], sizes = [16, 16], strides = [1, 1]} : vector<32x16xf32> to vector<16x16xf32>
    %c0_103 = arith.constant 0 : index
    %c0_104 = arith.constant 0 : index
    %162 = vector.load %arg36[%c0_103, %c0_104] : memref<32x16xf32, #tpu.memory_space<vmem>>, vector<16x16xf32>
    tpu.vector_store %arg36[%c0_103, %c0_104], %161 {strides = array<i32>} : memref<32x16xf32, #tpu.memory_space<vmem>>, vector<16x16xf32>,
    %163 = vector.extract_strided_slice %152 {offsets = [16, 0], sizes = [16, 16], strides = [1, 1]} : vector<32x16xf32> to vector<16x16xf32>
    %cst_105 = arith.constant dense<0.000000e+00> : vector<16x2xf32>
    %164 = tpu.matmul %163, %2, %cst_105 {dimension_numbers = #tpu.dot_dimension_numbers<[1], [0], [0], [1], [0, 0, 1, 1], [], []>} : vector<16x16xf32>, vector<16x2xf32>, vector<16x2xf32> -> vector<16x2xf32>
    %cst_106 = arith.constant dense<0.000000e+00> : vector<16x2xf32>
    %165 = tpu.matmul %155, %164, %cst_106 {dimension_numbers = #tpu.dot_dimension_numbers<[1], [0], [0], [1], [0, 0, 1, 1], [], []>} : vector<16x16xf32>, vector<16x2xf32>, vector<16x2xf32> -> vector<16x2xf32>
    %cst_107 = arith.constant 1.250000e-01 : f32
    %166 = vector.broadcast %cst_107 : f32 to vector<16x2xf32>
    %167 = arith.mulf %165, %166 : vector<16x2xf32>
    %cst_108 = arith.constant dense<0.000000e+00> : vector<16x16xf32>
    %168 = tpu.matmul %167, %3, %cst_108 {dimension_numbers = #tpu.dot_dimension_numbers<[1], [0], [0], [1], [0, 0, 1, 1], [], []>} : vector<16x2xf32>, vector<2x16xf32>, vector<16x16xf32> -> vector<16x16xf32>
    %169 = arith.subf %163, %168 : vector<16x16xf32>
    %170 = arith.mulf %169, %169 : vector<16x16xf32>
    %cst_109 = arith.constant dense<0.000000e+00> : vector<16x2xf32>
    %171 = tpu.matmul %170, %2, %cst_109 {dimension_numbers = #tpu.dot_dimension_numbers<[1], [0], [0], [1], [0, 0, 1, 1], [], []>} : vector<16x16xf32>, vector<16x2xf32>, vector<16x2xf32> -> vector<16x2xf32>
    %cst_110 = arith.constant dense<0.000000e+00> : vector<16x2xf32>
    %172 = tpu.matmul %155, %171, %cst_110 {dimension_numbers = #tpu.dot_dimension_numbers<[1], [0], [0], [1], [0, 0, 1, 1], [], []>} : vector<16x16xf32>, vector<16x2xf32>, vector<16x2xf32> -> vector<16x2xf32>
    %cst_111 = arith.constant 1.250000e-01 : f32
    %173 = vector.broadcast %cst_111 : f32 to vector<16x2xf32>
    %174 = arith.mulf %172, %173 : vector<16x2xf32>
    %cst_112 = arith.constant 9.99999974E-6 : f32
    %175 = vector.broadcast %cst_112 : f32 to vector<16x2xf32>
    %176 = arith.addf %174, %175 : vector<16x2xf32>
    %177 = math.rsqrt %176 : vector<16x2xf32>
    %cst_113 = arith.constant dense<0.000000e+00> : vector<16x16xf32>
    %178 = tpu.matmul %177, %3, %cst_113 {dimension_numbers = #tpu.dot_dimension_numbers<[1], [0], [0], [1], [0, 0, 1, 1], [], []>} : vector<16x2xf32>, vector<2x16xf32>, vector<16x16xf32> -> vector<16x16xf32>
    %179 = arith.mulf %169, %178 : vector<16x16xf32>
    %180 = vector.broadcast %153 : vector<16x1xf32> to vector<16x16xf32>
    %181 = arith.mulf %179, %180 : vector<16x16xf32>
    %182 = vector.broadcast %154 : vector<16x1xf32> to vector<16x16xf32>
    %183 = arith.addf %181, %182 : vector<16x16xf32>
    %cst_114 = arith.constant 9.99999974E-6 : f32
    %184 = vector.broadcast %cst_114 : f32 to vector<16x2xf32>
    %185 = arith.addf %174, %184 : vector<16x2xf32>
    %186 = math.log %185 : vector<16x2xf32>
    %cst_115 = arith.constant dense<0.000000e+00> : vector<2xf32>
    %187 = vector.multi_reduction <add>, %186, %cst_115 [0] : vector<16x2xf32> to vector<2xf32>
    %188 = vector.shape_cast %187 : vector<2xf32> to vector<1x2xf32>
    %cst_116 = arith.constant 5.000000e-01 : f32
    %189 = vector.broadcast %cst_116 : f32 to vector<1x2xf32>
    %190 = arith.mulf %189, %188 : vector<1x2xf32>
    %191 = arith.subf %151, %190 : vector<1x2xf32>
    %192 = vector.extract_strided_slice %183 {offsets = [0, 0], sizes = [8, 16], strides = [1, 1]} : vector<16x16xf32> to vector<8x16xf32>
    %193 = vector.extract_strided_slice %183 {offsets = [8, 0], sizes = [8, 16], strides = [1, 1]} : vector<16x16xf32> to vector<8x16xf32>
    %cst_117 = arith.constant dense<0.000000e+00> : vector<32x16xf32>
    %194 = tpu.matmul %156, %192, %cst_117 {dimension_numbers = #tpu.dot_dimension_numbers<[1], [0], [0], [1], [0, 0, 1, 1], [], []>} : vector<32x8xf32>, vector<8x16xf32>, vector<32x16xf32> -> vector<32x16xf32>
    %cst_118 = arith.constant dense<0.000000e+00> : vector<32x16xf32>
    %195 = tpu.matmul %157, %1, %cst_118 {dimension_numbers = #tpu.dot_dimension_numbers<[1], [0], [0], [1], [0, 0, 1, 1], [], []>} : vector<32x32xf32>, vector<32x16xf32>, vector<32x16xf32> -> vector<32x16xf32>
    %196 = arith.addf %194, %195 : vector<32x16xf32>
    %197 = vector.broadcast %158 : vector<32x1xf32> to vector<32x16xf32>
    %198 = arith.addf %196, %197 : vector<32x16xf32>
    %cst_119 = arith.constant 0.000000e+00 : f32
    %199 = vector.broadcast %cst_119 : f32 to vector<32x16xf32>
    %200 = arith.maximumf %198, %199 : vector<32x16xf32>
    %cst_120 = arith.constant dense<0.000000e+00> : vector<16x16xf32>
    %201 = tpu.matmul %159, %200, %cst_120 {dimension_numbers = #tpu.dot_dimension_numbers<[1], [0], [0], [1], [0, 0, 1, 1], [], []>} : vector<16x32xf32>, vector<32x16xf32>, vector<16x16xf32> -> vector<16x16xf32>
    %202 = vector.broadcast %160 : vector<16x1xf32> to vector<16x16xf32>
    %203 = arith.addf %201, %202 : vector<16x16xf32>
    %204 = vector.extract_strided_slice %203 {offsets = [0, 0], sizes = [8, 16], strides = [1, 1]} : vector<16x16xf32> to vector<8x16xf32>
    %cst_121 = arith.constant 2.000000e+00 : f32
    %205 = vector.broadcast %cst_121 : f32 to vector<8x16xf32>
    %206 = arith.addf %204, %205 : vector<8x16xf32>
    %207 = vector.extract_strided_slice %203 {offsets = [8, 0], sizes = [8, 16], strides = [1, 1]} : vector<16x16xf32> to vector<8x16xf32>
    %cst_122 = arith.constant 0.000000e+00 : f32
    %208 = vector.broadcast %cst_122 : f32 to vector<8x16xf32>
    %209 = arith.subf %208, %206 : vector<8x16xf32>
    %cst_123 = arith.constant 0.000000e+00 : f32
    %210 = vector.broadcast %cst_123 : f32 to vector<8x16xf32>
    %211 = arith.maximumf %209, %210 : vector<8x16xf32>
    %212 = math.absf %206 : vector<8x16xf32>
    %cst_124 = arith.constant 0.000000e+00 : f32
    %213 = vector.broadcast %cst_124 : f32 to vector<8x16xf32>
    %214 = arith.subf %213, %212 : vector<8x16xf32>
    %215 = math.exp %214 : vector<8x16xf32>
    %cst_125 = arith.constant 1.000000e+00 : f32
    %216 = vector.broadcast %cst_125 : f32 to vector<8x16xf32>
    %217 = arith.addf %216, %215 : vector<8x16xf32>
    %218 = math.log %217 : vector<8x16xf32>
    %219 = arith.addf %211, %218 : vector<8x16xf32>
    %cst_126 = arith.constant 0.000000e+00 : f32
    %220 = vector.broadcast %cst_126 : f32 to vector<8x16xf32>
    %221 = arith.subf %220, %219 : vector<8x16xf32>
    %222 = math.exp %221 : vector<8x16xf32>
    %223 = arith.addf %193, %207 : vector<8x16xf32>
    %224 = arith.mulf %223, %222 : vector<8x16xf32>
    %cst_127 = arith.constant dense<0.000000e+00> : vector<16xf32>
    %225 = vector.multi_reduction <add>, %221, %cst_127 [0] : vector<8x16xf32> to vector<16xf32>
    %226 = vector.shape_cast %225 : vector<16xf32> to vector<1x16xf32>
    %cst_128 = arith.constant dense<0.000000e+00> : vector<1x2xf32>
    %227 = tpu.matmul %226, %2, %cst_128 {dimension_numbers = #tpu.dot_dimension_numbers<[1], [0], [0], [1], [0, 0, 1, 1], [], []>} : vector<1x16xf32>, vector<16x2xf32>, vector<1x2xf32> -> vector<1x2xf32>
    %228 = arith.addf %191, %227 : vector<1x2xf32>
    %229 = tpu.concatenate %192, %224 in 0 : vector<8x16xf32>, vector<8x16xf32> -> vector<16x16xf32>
    %c0_129 = arith.constant 0 : index
    %c0_130 = arith.constant 0 : index
    %230 = vector.load %arg28[%c0_129, %c0_130] : memref<16x1xf32, #tpu.memory_space<vmem>>, vector<16x1xf32>
    %c0_131 = arith.constant 0 : index
    %c0_132 = arith.constant 0 : index
    %231 = vector.load %arg29[%c0_131, %c0_132] : memref<16x1xf32, #tpu.memory_space<vmem>>, vector<16x1xf32>
    %c0_133 = arith.constant 0 : index
    %c0_134 = arith.constant 0 : index
    %232 = vector.load %arg30[%c0_133, %c0_134] : memref<16x16xf32, #tpu.memory_space<vmem>>, vector<16x16xf32>
    %c0_135 = arith.constant 0 : index
    %c0_136 = arith.constant 0 : index
    %233 = vector.load %arg31[%c0_135, %c0_136] : memref<32x8xf32, #tpu.memory_space<vmem>>, vector<32x8xf32>
    %c0_137 = arith.constant 0 : index
    %c0_138 = arith.constant 0 : index
    %234 = vector.load %arg32[%c0_137, %c0_138] : memref<32x32xf32, #tpu.memory_space<vmem>>, vector<32x32xf32>
    %c0_139 = arith.constant 0 : index
    %c0_140 = arith.constant 0 : index
    %235 = vector.load %arg33[%c0_139, %c0_140] : memref<32x1xf32, #tpu.memory_space<vmem>>, vector<32x1xf32>
    %c0_141 = arith.constant 0 : index
    %c0_142 = arith.constant 0 : index
    %236 = vector.load %arg34[%c0_141, %c0_142] : memref<16x32xf32, #tpu.memory_space<vmem>>, vector<16x32xf32>
    %c0_143 = arith.constant 0 : index
    %c0_144 = arith.constant 0 : index
    %237 = vector.load %arg35[%c0_143, %c0_144] : memref<16x1xf32, #tpu.memory_space<vmem>>, vector<16x1xf32>
    %cst_145 = arith.constant dense<0.000000e+00> : vector<16x2xf32>
    %238 = tpu.matmul %229, %2, %cst_145 {dimension_numbers = #tpu.dot_dimension_numbers<[1], [0], [0], [1], [0, 0, 1, 1], [], []>} : vector<16x16xf32>, vector<16x2xf32>, vector<16x2xf32> -> vector<16x2xf32>
    %cst_146 = arith.constant dense<0.000000e+00> : vector<16x2xf32>
    %239 = tpu.matmul %232, %238, %cst_146 {dimension_numbers = #tpu.dot_dimension_numbers<[1], [0], [0], [1], [0, 0, 1, 1], [], []>} : vector<16x16xf32>, vector<16x2xf32>, vector<16x2xf32> -> vector<16x2xf32>
    %cst_147 = arith.constant 1.250000e-01 : f32
    %240 = vector.broadcast %cst_147 : f32 to vector<16x2xf32>
    %241 = arith.mulf %239, %240 : vector<16x2xf32>
    %cst_148 = arith.constant dense<0.000000e+00> : vector<16x16xf32>
    %242 = tpu.matmul %241, %3, %cst_148 {dimension_numbers = #tpu.dot_dimension_numbers<[1], [0], [0], [1], [0, 0, 1, 1], [], []>} : vector<16x2xf32>, vector<2x16xf32>, vector<16x16xf32> -> vector<16x16xf32>
    %243 = arith.subf %229, %242 : vector<16x16xf32>
    %244 = arith.mulf %243, %243 : vector<16x16xf32>
    %cst_149 = arith.constant dense<0.000000e+00> : vector<16x2xf32>
    %245 = tpu.matmul %244, %2, %cst_149 {dimension_numbers = #tpu.dot_dimension_numbers<[1], [0], [0], [1], [0, 0, 1, 1], [], []>} : vector<16x16xf32>, vector<16x2xf32>, vector<16x2xf32> -> vector<16x2xf32>
    %cst_150 = arith.constant dense<0.000000e+00> : vector<16x2xf32>
    %246 = tpu.matmul %232, %245, %cst_150 {dimension_numbers = #tpu.dot_dimension_numbers<[1], [0], [0], [1], [0, 0, 1, 1], [], []>} : vector<16x16xf32>, vector<16x2xf32>, vector<16x2xf32> -> vector<16x2xf32>
    %cst_151 = arith.constant 1.250000e-01 : f32
    %247 = vector.broadcast %cst_151 : f32 to vector<16x2xf32>
    %248 = arith.mulf %246, %247 : vector<16x2xf32>
    %cst_152 = arith.constant 9.99999974E-6 : f32
    %249 = vector.broadcast %cst_152 : f32 to vector<16x2xf32>
    %250 = arith.addf %248, %249 : vector<16x2xf32>
    %251 = math.rsqrt %250 : vector<16x2xf32>
    %cst_153 = arith.constant dense<0.000000e+00> : vector<16x16xf32>
    %252 = tpu.matmul %251, %3, %cst_153 {dimension_numbers = #tpu.dot_dimension_numbers<[1], [0], [0], [1], [0, 0, 1, 1], [], []>} : vector<16x2xf32>, vector<2x16xf32>, vector<16x16xf32> -> vector<16x16xf32>
    %253 = arith.mulf %243, %252 : vector<16x16xf32>
    %254 = vector.broadcast %230 : vector<16x1xf32> to vector<16x16xf32>
    %255 = arith.mulf %253, %254 : vector<16x16xf32>
    %256 = vector.broadcast %231 : vector<16x1xf32> to vector<16x16xf32>
    %257 = arith.addf %255, %256 : vector<16x16xf32>
    %cst_154 = arith.constant 9.99999974E-6 : f32
    %258 = vector.broadcast %cst_154 : f32 to vector<16x2xf32>
    %259 = arith.addf %248, %258 : vector<16x2xf32>
    %260 = math.log %259 : vector<16x2xf32>
    %cst_155 = arith.constant dense<0.000000e+00> : vector<2xf32>
    %261 = vector.multi_reduction <add>, %260, %cst_155 [0] : vector<16x2xf32> to vector<2xf32>
    %262 = vector.shape_cast %261 : vector<2xf32> to vector<1x2xf32>
    %cst_156 = arith.constant 5.000000e-01 : f32
    %263 = vector.broadcast %cst_156 : f32 to vector<1x2xf32>
    %264 = arith.mulf %263, %262 : vector<1x2xf32>
    %265 = arith.subf %228, %264 : vector<1x2xf32>
    %266 = vector.extract_strided_slice %257 {offsets = [0, 0], sizes = [8, 16], strides = [1, 1]} : vector<16x16xf32> to vector<8x16xf32>
    %267 = vector.extract_strided_slice %257 {offsets = [8, 0], sizes = [8, 16], strides = [1, 1]} : vector<16x16xf32> to vector<8x16xf32>
    %cst_157 = arith.constant dense<0.000000e+00> : vector<32x16xf32>
    %268 = tpu.matmul %233, %266, %cst_157 {dimension_numbers = #tpu.dot_dimension_numbers<[1], [0], [0], [1], [0, 0, 1, 1], [], []>} : vector<32x8xf32>, vector<8x16xf32>, vector<32x16xf32> -> vector<32x16xf32>
    %cst_158 = arith.constant dense<0.000000e+00> : vector<32x16xf32>
    %269 = tpu.matmul %234, %1, %cst_158 {dimension_numbers = #tpu.dot_dimension_numbers<[1], [0], [0], [1], [0, 0, 1, 1], [], []>} : vector<32x32xf32>, vector<32x16xf32>, vector<32x16xf32> -> vector<32x16xf32>
    %270 = arith.addf %268, %269 : vector<32x16xf32>
    %271 = vector.broadcast %235 : vector<32x1xf32> to vector<32x16xf32>
    %272 = arith.addf %270, %271 : vector<32x16xf32>
    %cst_159 = arith.constant 0.000000e+00 : f32
    %273 = vector.broadcast %cst_159 : f32 to vector<32x16xf32>
    %274 = arith.maximumf %272, %273 : vector<32x16xf32>
    %cst_160 = arith.constant dense<0.000000e+00> : vector<16x16xf32>
    %275 = tpu.matmul %236, %274, %cst_160 {dimension_numbers = #tpu.dot_dimension_numbers<[1], [0], [0], [1], [0, 0, 1, 1], [], []>} : vector<16x32xf32>, vector<32x16xf32>, vector<16x16xf32> -> vector<16x16xf32>
    %276 = vector.broadcast %237 : vector<16x1xf32> to vector<16x16xf32>
    %277 = arith.addf %275, %276 : vector<16x16xf32>
    %278 = vector.extract_strided_slice %277 {offsets = [0, 0], sizes = [8, 16], strides = [1, 1]} : vector<16x16xf32> to vector<8x16xf32>
    %cst_161 = arith.constant 2.000000e+00 : f32
    %279 = vector.broadcast %cst_161 : f32 to vector<8x16xf32>
    %280 = arith.addf %278, %279 : vector<8x16xf32>
    %281 = vector.extract_strided_slice %277 {offsets = [8, 0], sizes = [8, 16], strides = [1, 1]} : vector<16x16xf32> to vector<8x16xf32>
    %cst_162 = arith.constant 0.000000e+00 : f32
    %282 = vector.broadcast %cst_162 : f32 to vector<8x16xf32>
    %283 = arith.subf %282, %280 : vector<8x16xf32>
    %cst_163 = arith.constant 0.000000e+00 : f32
    %284 = vector.broadcast %cst_163 : f32 to vector<8x16xf32>
    %285 = arith.maximumf %283, %284 : vector<8x16xf32>
    %286 = math.absf %280 : vector<8x16xf32>
    %cst_164 = arith.constant 0.000000e+00 : f32
    %287 = vector.broadcast %cst_164 : f32 to vector<8x16xf32>
    %288 = arith.subf %287, %286 : vector<8x16xf32>
    %289 = math.exp %288 : vector<8x16xf32>
    %cst_165 = arith.constant 1.000000e+00 : f32
    %290 = vector.broadcast %cst_165 : f32 to vector<8x16xf32>
    %291 = arith.addf %290, %289 : vector<8x16xf32>
    %292 = math.log %291 : vector<8x16xf32>
    %293 = arith.addf %285, %292 : vector<8x16xf32>
    %cst_166 = arith.constant 0.000000e+00 : f32
    %294 = vector.broadcast %cst_166 : f32 to vector<8x16xf32>
    %295 = arith.subf %294, %293 : vector<8x16xf32>
    %296 = math.exp %295 : vector<8x16xf32>
    %297 = arith.addf %267, %281 : vector<8x16xf32>
    %298 = arith.mulf %297, %296 : vector<8x16xf32>
    %cst_167 = arith.constant dense<0.000000e+00> : vector<16xf32>
    %299 = vector.multi_reduction <add>, %295, %cst_167 [0] : vector<8x16xf32> to vector<16xf32>
    %300 = vector.shape_cast %299 : vector<16xf32> to vector<1x16xf32>
    %cst_168 = arith.constant dense<0.000000e+00> : vector<1x2xf32>
    %301 = tpu.matmul %300, %2, %cst_168 {dimension_numbers = #tpu.dot_dimension_numbers<[1], [0], [0], [1], [0, 0, 1, 1], [], []>} : vector<1x16xf32>, vector<16x2xf32>, vector<1x2xf32> -> vector<1x2xf32>
    %302 = arith.addf %265, %301 : vector<1x2xf32>
    %303 = tpu.concatenate %266, %298 in 0 : vector<8x16xf32>, vector<8x16xf32> -> vector<16x16xf32>
    %c16 = arith.constant 16 : index
    %c0_169 = arith.constant 0 : index
    %304 = vector.load %arg36[%c16, %c0_169] : memref<32x16xf32, #tpu.memory_space<vmem>>, vector<16x16xf32>
    tpu.vector_store %arg36[%c16, %c0_169], %303 {strides = array<i32>} : memref<32x16xf32, #tpu.memory_space<vmem>>, vector<16x16xf32>,
    %c0_170 = arith.constant 0 : index
    %c0_171 = arith.constant 0 : index
    %305 = vector.load %arg37[%c0_170, %c0_171] : memref<1x2xf32, #tpu.memory_space<vmem>>, vector<1x2xf32>
    tpu.vector_store %arg37[%c0_170, %c0_171], %302 {strides = array<i32>} : memref<1x2xf32, #tpu.memory_space<vmem>>, vector<1x2xf32>,
    return
  }
}

</mosaic_0001>

<bundles_post_ra>
// kernel: tpu_custom_call.1
= control target key start
LH: loop header
LB: loop body
LE: loop exit
PB: predicated region body
PF: predicated region fallthrough
CT: control target
= control target key end

     0   :  { %s5527_s6 = smov 1   ;;  %s5528_s10 = smov 2   ;;  %s6227_s0 = inlined_call_operand.smem [shape: u32[38], index: -1, kind: input, shape index: {}] }
   0x1   :  { %s5577_s5 = sld [smem:[%s6227_s0]]   ;;  %s5529_s14 = smov 3  }
   0x2   :  { %s5582_s9 = sld [smem:[%s6227_s0 + %s5527_s6]]   ;;  %s5530_s18 = smov 4  }
   0x3   :  { %s5587_s13 = sld [smem:[%s6227_s0 + %s5528_s10]]   ;;  %s5531_s22 = smov 5  }
   0x4   :  { %s5592_s17 = sld [smem:[%s6227_s0 + %s5529_s14]]   ;;  %s5532_s26 = smov 6  }
   0x5   :  { %s5597_s21 = sld [smem:[%s6227_s0 + %s5530_s18]]   ;;  %s5533_s30 = smov 7  }
   0x6   :  { %s5602_s25 = sld [smem:[%s6227_s0 + %s5531_s22]]   ;;  %s5534_s4 = smov 8  }
   0x7   :  { %s5607_s29 = sld [smem:[%s6227_s0 + %s5532_s26]]   ;;  %s5535_s10 = smov 9  }
   0x8   :  { %6248 = sst [smem:[#allocation5_spill]] %s5582_s9  ;;  %s5536_s15 = smov 10  }
   0x9   :  { %s5612_s3 = sld [smem:[%s6227_s0 + %s5533_s30]]   ;;  %s5537_s20 = smov 11  }
   0xa   :  { %s5617_s8 = sld [smem:[%s6227_s0 + %s5534_s4]]   ;;  %s5538_s26 = smov 12  }
   0xb   :  { %s5622_s14 = sld [smem:[%s6227_s0 + %s5535_s10]]   ;;  %s5539_s1 = smov 13  }
   0xc   :  { %s5627_s19 = sld [smem:[%s6227_s0 + %s5536_s15]]   ;;  %s5540_s7 = smov 14  }
   0xd   :  { %s5632_s24 = sld [smem:[%s6227_s0 + %s5537_s20]]   ;;  %s5541_s15 = smov 15  }
   0xe   :  { %s5637_s30 = sld [smem:[%s6227_s0 + %s5538_s26]]   ;;  %s5542_s22 = smov 16  }
   0xf   :  { %6249 = sst [smem:[#allocation6_spill]] %s5612_s3  ;;  %s5543_s28 = smov 17  }
  0x10   :  { %6250 = sst [smem:[#allocation7_spill]] %s5617_s8 }
  0x11   :  { %s5642_s6 = sld [smem:[%s6227_s0 + %s5539_s1]]  }
  0x12   :  { %6251 = sst [smem:[#allocation8_spill]] %s5627_s19 }
  0x13   :  { %s5647_s12 = sld [smem:[%s6227_s0 + %s5540_s7]]   ;;  %s5544_s7 = smov 18  }
  0x14   :  { %s5652_s20 = sld [smem:[%s6227_s0 + %s5541_s15]]   ;;  %s5545_s15 = smov 19  }
  0x15   :  { %s5657_s27 = sld [smem:[%s6227_s0 + %s5542_s22]]   ;;  %s5546_s22 = smov 20  }
  0x16   :  { %s5662_s4 = sld [smem:[%s6227_s0 + %s5543_s28]]   ;;  %s5547_s28 = smov 21  }
  0x17   :  { %s5682_s19 = sld [smem:[%s6227_s0 + %s5547_s28]]   ;;  %s5551_s28 = smov 25  }
  0x18   :  { %s5702_s9 = sld [smem:[%s6227_s0 + %s5551_s28]]   ;;  %s5555_s28 = smov 29  }
  0x19   :  { %6252 = sst [smem:[#allocation9_spill]] %s5647_s12 }
  0x1a   :  { %6253 = sst [smem:[#allocation10_spill]] %s5652_s20 }
  0x1b   :  { %6254 = sst [smem:[#allocation11_spill]] %s5657_s27 }
  0x1c   :  { %s5667_s12 = sld [smem:[%s6227_s0 + %s5544_s7]]   ;;  %s5548_s7 = smov 22  }
  0x1d   :  { %s5672_s20 = sld [smem:[%s6227_s0 + %s5545_s15]]   ;;  %s5549_s15 = smov 23  }
  0x1e   :  { %s5677_s27 = sld [smem:[%s6227_s0 + %s5546_s22]]   ;;  %s5550_s22 = smov 24  }
  0x1f   :  { %s5692_s3 = sld [smem:[%s6227_s0 + %s5549_s15]]   ;;  %s5553_s15 = smov 27  }
  0x20   :  { %s5697_s8 = sld [smem:[%s6227_s0 + %s5550_s22]]   ;;  %s5554_s22 = smov 28  }
  0x21   :  { %6259 = sst [smem:[#allocation16_spill]] %s5702_s9 }
  0x22   :  { %6255 = sst [smem:[#allocation12_spill]] %s5667_s12 }
  0x23   :  { %s5687_s12 = sld [smem:[%s6227_s0 + %s5548_s7]]   ;;  %s5552_s7 = smov 26  }
  0x24   :  { %s5722_s9 = sld [smem:[%s6227_s0 + %s5555_s28]]   ;;  %s5559_s28 = smov 33  }
  0x25   :  { %6257 = sst [smem:[#allocation14_spill]] %s5692_s3 }
  0x26   :  { %6258 = sst [smem:[#allocation15_spill]] %s5697_s8 }
  0x27   :  { %s5712_s3 = sld [smem:[%s6227_s0 + %s5553_s15]]   ;;  %s5557_s15 = smov 31  }
  0x28   :  { %s5717_s8 = sld [smem:[%s6227_s0 + %s5554_s22]]   ;;  %s5558_s22 = smov 32  }
  0x29   :  { %6256 = sst [smem:[#allocation13_spill]] %s5687_s12 }
  0x2a   :  { %s5707_s12 = sld [smem:[%s6227_s0 + %s5552_s7]]   ;;  %s5556_s7 = smov 30  }
  0x2b   :  { %6263 = sst [smem:[#allocation20_spill]] %s5722_s9 }
  0x2c   :  { %s5742_s9 = sld [smem:[%s6227_s0 + %s5559_s28]]   ;;  %s5563_s28 = smov 37  }
  0x2d   :  { %6261 = sst [smem:[#allocation18_spill]] %s5712_s3 }
  0x2e   :  { %6262 = sst [smem:[#allocation19_spill]] %s5717_s8 }
  0x2f   :  { %s5732_s3 = sld [smem:[%s6227_s0 + %s5557_s15]]   ;;  %s5561_s15 = smov 35  }
  0x30   :  { %6260 = sst [smem:[#allocation17_spill]] %s5707_s12 }
  0x31   :  { %s5727_s12 = sld [smem:[%s6227_s0 + %s5556_s7]]   ;;  %s5560_s7 = smov 34  }
  0x32   :  { %s5737_s8 = sld [smem:[%s6227_s0 + %s5558_s22]]   ;;  %s5562_s22 = smov 36  }
  0x33   :  { %6267 = sst [smem:[#allocation24_spill]] %s5742_s9 }
  0x34   :  { %s5762_s9 = sld [smem:[%s6227_s0 + %s5563_s28]]  }
  0x35   :  { %6265 = sst [smem:[#allocation22_spill]] %s5732_s3 }
  0x36   :  { %s5752_s3 = sld [smem:[%s6227_s0 + %s5561_s15]]  }
  0x37   :  { %6264 = sst [smem:[#allocation21_spill]] %s5727_s12 }
  0x38   :  { %6266 = sst [smem:[#allocation23_spill]] %s5737_s8 }
  0x39   :  { %s5747_s12 = sld [smem:[%s6227_s0 + %s5560_s7]]  }
  0x3a   :  { %s5757_s8 = sld [smem:[%s6227_s0 + %s5562_s22]]  }
  0x3b   :  { %v162_v0 = vld [vmem:[%s5587_s13] sm:$0xff]  ;;  %v163_v1 = vld [vmem:[%s5587_s13 + $0x8] sm:$0xff]  ;;  %vm197_vm0 = vcmask 130048  }
  0x3c   :  { %v154_v2 = vld [vmem:[%s5577_s5] sm:$0xff]  ;;  %v5767_v3 = vpack.c.bf16 %v163_v1, %v162_v0 }
  0x3d   :  { %4820 = vmatprep.mubr.msk.f32.mxu1 %vm197_vm0, %v154_v2 }
  0x3e   :  { %81 = vsyncpa [#allocation3], 0  ;;  %5191 = vmatprep.subr.bf16.mxu1 %v5767_v3  ;;  %v155_v4 = vld [vmem:[%s5577_s5 + $0x8] sm:$0xff]  ;;  %v156_v5 = vld [vmem:[%s5577_s5 + $0x10] sm:$0xff]  ;;  %vm295_vm1 = vcmask 261120   ;;  %vm410_vm2 = vcmask 1041408  }
  0x3f   :  { %5193 = vmatpush3.bf16.msra.mxu1 %v5767_v3  ;;  %v157_v6 = vld [vmem:[%s5577_s5 + $0x18] sm:$0xff]  ;;  %v173_v7 = vld [vmem:[%s5607_s29] sm:$0xff]  ;;  %v174_v14 = vld [vmem:[%s5607_s29 + $0x8] sm:$0xff]  ;;  %vm397_vm3 = vcmask 15360   ;;  %v5564_v38 = vmov 0   ;;  %s6268_s0 = sld [smem:[#allocation16_spill]] }
  0x40   :  { %v175_v15 = vld [vmem:[%s5607_s29 + $0x10] sm:$0xff]  ;;  %v176_v16 = vld [vmem:[%s5607_s29 + $0x18] sm:$0xff]  ;;  %v5789_v17 = vld [vmem:[%s5592_s17] sm:$0x3]  ;;  %5416 = vset.pattern.permute.xlu0 %v5564_v38  ;;  %5417 = vset.pattern.permute.xlu1 %v5564_v38  ;;  %s6269_s5 = sld [smem:[#allocation18_spill]]  ;;  %s6270_s13 = sld [smem:[#allocation19_spill]] }
  0x41   :  { %4840 = vmatprep.subr.msk.mxu0 %vm410_vm2, %v5789_v17  ;;  %v165_v45 = vld [vmem:[%s5597_s21] sm:$0xff]  ;;  %v166_v47 = vld [vmem:[%s5597_s21 + $0x8] sm:$0xff]  ;;  %v187_v51 = vld [vmem:[%s5622_s14 + $0x10] sm:$0xff]  ;;  %s6273_s29 = sld [smem:[#allocation5_spill]]  ;;  %vm5566_vm4 = vmmov 0   ;;  %vm3136_vm5 = vcmask 64512  }
  0x42   :  { %4821 = vmatmul.mubr.msk.f32.vlgmr.msra.gmra.mrb[0].mxu1 %vm197_vm0, %v155_v4  ;;  %4841 = vmatpush3.msk.msra.mxu0 %vm410_vm2, %v5789_v17  ;;  %v169_v46 = vld [vmem:[%s5602_s25] sm:$0xff]  ;;  %v170_v48 = vld [vmem:[%s5602_s25 + $0x8] sm:$0xff]  ;;  %v188_v52 = vld [vmem:[%s5622_s14 + $0x18] sm:$0xff]  ;;  %s6284_s7 = sld [smem:[#allocation17_spill]]  ;;  %s6285_s10 = sld [smem:[#allocation21_spill]]  ;;  %vm4417_vm6 = vcmask 8192  }
  0x43   :  { %4823 = vmatprep.mubr.msk.f32.mxu1 %vm197_vm0, %v156_v5  ;;  %804 = vperm.xlu0 %5416, %v165_v45   ;;  %v185_v49 = vld [vmem:[%s5622_s14] sm:$0xff]  ;;  %v186_v50 = vld [vmem:[%s5622_s14 + $0x8] sm:$0xff]  ;;  %v167_v55 = vld [vmem:[%s5597_s21 + $0x10] sm:$0xff]  ;;  %s6275_s14 = sld [smem:[#allocation6_spill]]  ;;  %s6286_s11 = sld [smem:[#allocation23_spill]] }
  0x44   :  { %828 = vperm.xlu1 %5417, %v169_v46   ;;  %v193_v53 = vld [vmem:[%s5632_s24] sm:$0xff]  ;;  %v194_v54 = vld [vmem:[%s5632_s24 + $0x8] sm:$0xff]  ;;  %v168_v56 = vld [vmem:[%s5597_s21 + $0x18] sm:$0xff]  ;;  %s6271_s21 = sld [smem:[#allocation20_spill]]  ;;  %s6287_s15 = sld [smem:[#allocation22_spill]] }
  0x45   :  { %v171_v57 = vld [vmem:[%s5602_s25 + $0x10] sm:$0xff]  ;;  %v172_v59 = vld [vmem:[%s5602_s25 + $0x18] sm:$0xff]  ;;  %v1327_v61 = vld [vmem:[%s5637_s30] sm:$0xff]  ;;  %s6272_s25 = sld [smem:[#allocation24_spill]] }
  0x46   :  { %4824 = vmatmul.mubr.msk.f32.gmra.mrb[2].mxu1 %vm197_vm0, %v157_v6  ;;  %v195_v58 = vld [vmem:[%s5632_s24 + $0x10] sm:$0xff]  ;;  %v196_v60 = vld [vmem:[%s5632_s24 + $0x18] sm:$0xff]  ;;  %v1328_v62 = vld [vmem:[%s5637_s30 + $0x8] sm:$0xff]  ;;  %s6277_s24 = sld [smem:[#allocation9_spill]] }
  0x47   :  { %4834 = vmatprep.mubr.msk.f32.mxu1 %vm295_vm1, %v173_v7  ;;  %809 = vperm.xlu0 %5416, %v166_v47   ;;  %v1331_v63 = vld [vmem:[%s5642_s6] sm:$0xff]  ;;  %v1332_v0 = vld [vmem:[%s5642_s6 + $0x8] sm:$0xff] }
  0x48   :  { %833 = vperm.xlu1 %5417, %v170_v48   ;;  %v1347_v1 = vld [vmem:[%s5662_s4] sm:$0xff] }
  0x49   :  { %v158_v38 = vld [vmem:[%s6273_s29] sm:$0xff] }
  0x4b   :  { %1069 = vperm.xlu0 %5416, %v185_v49  }
  0x4c   :  { %1074 = vperm.xlu1 %5417, %v186_v50  }
  0x4f   :  { %1079 = vperm.xlu0 %5416, %v187_v51  }
  0x50   :  { %1084 = vperm.xlu1 %5417, %v188_v52  }
  0x53   :  { %1097 = vperm.xlu0 %5416, %v193_v53  }
  0x54   :  { %1102 = vperm.xlu1 %5417, %v194_v54  }
  0x57   :  { %814 = vperm.xlu0 %5416, %v167_v55  }
  0x58   :  { %819 = vperm.xlu1 %5417, %v168_v56  }
  0x5b   :  { %838 = vperm.xlu0 %5416, %v171_v57  }
  0x5c   :  { %1107 = vperm.xlu1 %5417, %v195_v58  }
  0x5f   :  { %843 = vperm.xlu0 %5416, %v172_v59  }
  0x60   :  { %1112 = vperm.xlu1 %5417, %v196_v60  }
  0x63   :  { %1959 = vperm.xlu0 %5416, %v1327_v61  }
  0x64   :  { %1964 = vperm.xlu1 %5417, %v1328_v62  }
  0x67   :  { %1983 = vperm.xlu0 %5416, %v1331_v63  }
  0x68   :  { %1988 = vperm.xlu1 %5417, %v1332_v0  }
  0x6b   :  { %2224 = vperm.xlu0 %5416, %v1347_v1  }
 0x115   :  { %v4822_v8 = vpop.f32.mrb[0].mxu1 }
 0x116   :  { %v276_v9 = vpop.f32.mrb[1].mxu1 }
 0x117   :  { %v5194_v10 = vpack.c.bf16 %v4822_v8, %v276_v9  ;;  %v1329_v8 = vld [vmem:[%s5637_s30 + $0x10] sm:$0xff]  ;;  %v1330_v9 = vld [vmem:[%s5637_s30 + $0x18] sm:$0xff]  ;;  %s6278_s30 = sld [smem:[#allocation11_spill]] }
 0x119   :  { %v4825_v11 = vpop.f32.mrb[2].mxu1  ;;  %5195 = vmatprep.subr.bf16.mxu1 %v5194_v10 }
 0x11a   :  { %v286_v12 = vpop.f32.mrb[3].mxu1  ;;  %5197 = vmatpush3.bf16.msra.mxu1 %v5194_v10  ;;  %v1333_v10 = vld [vmem:[%s5642_s6 + $0x10] sm:$0xff] }
 0x11b   :  { %v5198_v13 = vpack.c.bf16 %v4825_v11, %v286_v12  ;;  %v1357_v11 = vld [vmem:[%s5672_s20 + $0x10] sm:$0xff]  ;;  %v1334_v12 = vld [vmem:[%s5642_s6 + $0x18] sm:$0xff]  ;;  %s6279_s6 = sld [smem:[#allocation10_spill]] }
 0x11d   :  { %5199 = vmatprep.subr.bf16.mxu1 %v5198_v13 }
 0x11e   :  { %5201 = vmatpush3.bf16.msra.mxu1 %v5198_v13  ;;  %v1358_v13 = vld [vmem:[%s5672_s20 + $0x18] sm:$0xff] }
 0x11f   :  { %5203 = vmatprep.subr.bf16.mxu1 %v5767_v3 }
 0x121   :  { %4835 = vmatmul.mubr.msk.f32.vlgmr.msra.gmra.mrb[4].mxu1 %vm295_vm1, %v174_v14 }
 0x122   :  { %4837 = vmatprep.mubr.msk.f32.mxu1 %vm295_vm1, %v175_v15  ;;  %5205 = vmatpush3.bf16.msra.mxu1 %v5767_v3 }
 0x123   :  { %4872 = vmatprep.subr.msk.mxu1 %vm410_vm2, %v5789_v17 }
 0x125   :  { %4838 = vmatmul.mubr.msk.f32.gmra.mrb[6].mxu1 %vm295_vm1, %v176_v16 }
 0x1f4   :  { %v4836_v18 = vpop.f32.mrb[4].mxu1 }
 0x1f5   :  { %v374_v19 = vpop.f32.mrb[5].mxu1  ;;  %v394_v21 = vmul.f32 0.125, %v4836_v18  ;;  %v2497_v18 = vld [vmem:[%s6268_s0 + $0x8] sm:$0xff] }
 0x1f6   :  { %v393_v20 = vmul.f32 0.125, %v374_v19  ;;  %v2498_v19 = vld [vmem:[%s6268_s0 + $0x10] sm:$0xff] }
 0x1f8   :  { %v4839_v22 = vpop.f32.mrb[6].mxu1  ;;  %4842 = vmatprep.mubr.msk.f32.mxu0 %vm397_vm3, %v393_v20  ;;  %v2499_v20 = vld [vmem:[%s6268_s0 + $0x18] sm:$0xff] }
 0x1f9   :  { %v384_v23 = vpop.f32.mrb[7].mxu1  ;;  %4843 = vmatmul.mubr.msk.f32.vlgmr.msra.gmra.mrb[0].mxu0 %vm397_vm3, %v394_v21  ;;  %v396_v25 = vmul.f32 0.125, %v4839_v22  ;;  %v2502_v21 = vld [vmem:[%s6269_s5] sm:$0xff]  ;;  %v2483_v22 = vld [vmem:[%s5677_s27 + $0x8] sm:$0xff] }
 0x1fa   :  { %v395_v24 = vmul.f32 0.125, %v384_v23  ;;  %v2485_v23 = vld [vmem:[%s5682_s19 + $0x8] sm:$0xff] }
 0x1fc   :  { %4845 = vmatprep.mubr.msk.f32.mxu0 %vm397_vm3, %v395_v24  ;;  %v2503_v24 = vld [vmem:[%s6269_s5 + $0x8] sm:$0xff] }
 0x1fd   :  { %4846 = vmatmul.mubr.msk.f32.gmra.mrb[2].mxu0 %vm397_vm3, %v396_v25  ;;  %v3450_v25 = vld [vmem:[%s6270_s13] sm:$0xff] }
 0x1fe   :  { %4866 = vmatprep.mubr.msk.f32.mxu0 %vm295_vm1, %v173_v7  ;;  %v1356_v7 = vld [vmem:[%s5672_s20 + $0x8] sm:$0xff] }
 0x2cc   :  { %v4844_v26 = vpop.f32.mrb[0].mxu0 }
 0x2cd   :  { %v5802_v27 = vsub.f32 %v155_v4, %v4844_v26  ;;  %v480_v28 = vpop.f32.mrb[1].mxu0  ;;  %v1349_v4 = vld [vmem:[%s5662_s4 + $0x10] sm:$0xff]  ;;  %v3452_v26 = vld [vmem:[%s6271_s21] sm:$0xff] }
 0x2ce   :  { %v5804_v29 = vsub.f32 %v154_v2, %v480_v28  ;;  %v1348_v2 = vld [vmem:[%s5662_s4 + $0x8] sm:$0xff]  ;;  %2234 = vperm.xlu0 %5416, %v1349_v4   ;;  %v3464_v28 = vld [vmem:[%s6272_s25] sm:$0xff] }
 0x2cf   :  { %v504_v32 = vmul.f32 %v5802_v27, %v5802_v27  ;;  %2229 = vperm.xlu1 %5417, %v1348_v2  }
 0x2d0   :  { %v503_v30 = vmul.f32 %v5804_v29, %v5804_v29  ;;  %v4847_v31 = vpop.f32.mrb[2].mxu0 }
 0x2d1   :  { %v5810_v33 = vsub.f32 %v157_v6, %v4847_v31  ;;  %v490_v34 = vpop.f32.mrb[3].mxu0  ;;  %v1355_v6 = vld [vmem:[%s5672_s20] sm:$0xff]  ;;  %v3466_v31 = vld [vmem:[%s6272_s25 + $0x10] sm:$0xff]  ;;  %s6280_s20 = sld [smem:[#allocation12_spill]] }
 0x2d2   :  { %v5812_v35 = vsub.f32 %v156_v5, %v490_v34  ;;  %4852 = vmatprep.mubr.msk.f32.mxu1 %vm197_vm0, %v503_v30  ;;  %v1350_v5 = vld [vmem:[%s5662_s4 + $0x18] sm:$0xff]  ;;  %2252 = vperm.xlu0 %5416, %v1355_v6   ;;  %v3465_v30 = vld [vmem:[%s6272_s25 + $0x8] sm:$0xff]  ;;  %v3470_v34 = vld [vmem:[%s5752_s3] sm:$0xff]  ;;  %s6283_s4 = sld [smem:[#allocation14_spill]] }
 0x2d3   :  { %4853 = vmatmul.mubr.msk.f32.vlgmr.msra.gmra.mrb[8].mxu1 %vm197_vm0, %v504_v32  ;;  %v506_v37 = vmul.f32 %v5810_v33, %v5810_v33  ;;  %2239 = vperm.xlu1 %5417, %v1350_v5   ;;  %v3467_v32 = vld [vmem:[%s6272_s25 + $0x18] sm:$0xff] }
 0x2d4   :  { %v505_v36 = vmul.f32 %v5812_v35, %v5812_v35  ;;  %4873 = vmatpush3.msk.msra.mxu1 %vm410_vm2, %v5789_v17 }
 0x2d6   :  { %4855 = vmatprep.mubr.msk.f32.mxu1 %vm197_vm0, %v505_v36  ;;  %1969 = vperm.xlu0 %5416, %v1329_v8   ;;  %v3451_v36 = vld [vmem:[%s6270_s13 + $0x8] sm:$0xff] }
 0x2d7   :  { %4856 = vmatmul.mubr.msk.f32.gmra.mrb[10].mxu1 %vm197_vm0, %v506_v37  ;;  %2257 = vperm.xlu1 %5417, %v1356_v7   ;;  %v3453_v37 = vld [vmem:[%s6271_s21 + $0x8] sm:$0xff] }
 0x2da   :  { %1993 = vperm.xlu0 %5416, %v1333_v10   ;;  %v160_v10 = vld [vmem:[%s6273_s29 + $0x10] sm:$0xff] }
 0x2db   :  { %1974 = vperm.xlu1 %5417, %v1330_v9  }
 0x2de   :  { %1998 = vperm.xlu0 %5416, %v1334_v12  }
 0x2df   :  { %2262 = vperm.xlu1 %5417, %v1357_v11   ;;  %v161_v11 = vld [vmem:[%s6273_s29 + $0x18] sm:$0xff] }
 0x2e0   :  { %v5897_v12 = vpack.c.bf16 %v161_v11, %v160_v10 }
 0x2e3   :  { %2267 = vperm.xlu1 %5417, %v1358_v13  }
 0x3a6   :  { %v4854_v39 = vpop.f32.mrb[8].mxu1 }
 0x3a7   :  { %v585_v40 = vpop.f32.mrb[9].mxu1 }
 0x3a8   :  { %v5206_v41 = vpack.c.bf16 %v4854_v39, %v585_v40  ;;  %v159_v39 = vld [vmem:[%s6273_s29 + $0x8] sm:$0xff] }
 0x3a9   :  { %v5880_v40 = vpack.c.bf16 %v159_v39, %v158_v38  ;;  %v180_v38 = vld [vmem:[%s6275_s14 + $0x18] sm:$0xff] }
 0x3aa   :  { %v4857_v42 = vpop.f32.mrb[10].mxu1  ;;  %5207 = vmatprep.subr.bf16.mxu0 %v5206_v41 }
 0x3ab   :  { %v595_v43 = vpop.f32.mrb[11].mxu1  ;;  %5209 = vmatpush3.bf16.msra.mxu0 %v5206_v41  ;;  %v3471_v41 = vld [vmem:[%s5752_s3 + $0x8] sm:$0xff]  ;;  %s6274_s3 = sld [smem:[#allocation7_spill]] }
 0x3ac   :  { %v5210_v44 = vpack.c.bf16 %v4857_v42, %v595_v43 }
 0x3ae   :  { %5211 = vmatprep.subr.bf16.mxu0 %v5210_v44 }
 0x3af   :  { %5213 = vmatpush3.bf16.msra.mxu0 %v5210_v44 }
 0x3b0   :  { %5215 = vmatprep.subr.bf16.mxu0 %v5880_v40 }
 0x3b1   :  { %v181_v13 = vld [vmem:[%s6274_s3] sm:$0xff] }
 0x3b2   :  { %4867 = vmatmul.mubr.msk.f32.vlgmr.msra.gmra.mrb[4].mxu0 %vm295_vm1, %v174_v14  ;;  %v2482_v14 = vld [vmem:[%s5677_s27] sm:$0xff]  ;;  %s6282_s27 = sld [smem:[#allocation15_spill]] }
 0x3b3   :  { %4869 = vmatprep.mubr.msk.f32.mxu0 %vm295_vm1, %v175_v15  ;;  %v2484_v15 = vld [vmem:[%s5682_s19] sm:$0xff]  ;;  %3002 = vperm.xlu0 %5416, %v2482_v14   ;;  %v182_v14 = vld [vmem:[%s6274_s3 + $0x8] sm:$0xff]  ;;  %s6276_s19 = sld [smem:[#allocation8_spill]] }
 0x3b4   :  { %3014 = vperm.xlu1 %5417, %v2484_v15   ;;  %5217 = vmatpush3.bf16.msra.mxu0 %v5880_v40  ;;  %v183_v15 = vld [vmem:[%s6274_s3 + $0x10] sm:$0xff] }
 0x3b5   :  { %5219 = vmatprep.subr.bf16.mxu0 %v5897_v12 }
 0x3b6   :  { %4870 = vmatmul.mubr.msk.f32.gmra.mrb[6].mxu0 %vm295_vm1, %v176_v16  ;;  %v2496_v16 = vld [vmem:[%s6268_s0] sm:$0xff] }
 0x3b7   :  { %3236 = vperm.xlu0 %5416, %v2496_v16   ;;  %4888 = vmatprep.mubr.msk.f32.mxu0 %vm295_vm1, %v181_v13  ;;  %v184_v16 = vld [vmem:[%s6274_s3 + $0x18] sm:$0xff] }
 0x3b8   :  { %3241 = vperm.xlu1 %5417, %v2497_v18   ;;  %5221 = vmatpush3.bf16.msra.mxu0 %v5897_v12  ;;  %v177_v18 = vld [vmem:[%s6275_s14] sm:$0xff] }
 0x3b9   :  { %v189_v39 = vld [vmem:[%s6276_s19] sm:$0xff] }
 0x3bb   :  { %3246 = vperm.xlu0 %5416, %v2498_v19   ;;  %4889 = vmatmul.mubr.msk.f32.vlgmr.msra.gmra.mrb[8].mxu0 %vm295_vm1, %v182_v14  ;;  %v805_v19 = vpop.permute.xlu0 %804 }
 0x3bc   :  { %3251 = vperm.xlu1 %5417, %v2499_v20   ;;  %4891 = vmatprep.mubr.msk.f32.mxu0 %vm295_vm1, %v183_v15  ;;  %v829_v20 = vpop.permute.xlu1 %828 }
 0x3bf   :  { %3264 = vperm.xlu0 %5416, %v2502_v21   ;;  %4892 = vmatmul.mubr.msk.f32.gmra.mrb[10].mxu0 %vm295_vm1, %v184_v16 }
 0x3c0   :  { %3007 = vperm.xlu1 %5417, %v2483_v22   ;;  %4898 = vmatprep.mubr.msk.f32.mxu0 %vm197_vm0, %v177_v18 }
 0x3c3   :  { %3019 = vperm.xlu0 %5416, %v2485_v23  }
 0x3c4   :  { %3269 = vperm.xlu1 %5417, %v2503_v24   ;;  %v810_v24 = vpop.permute.xlu0 %809 }
 0x3c7   :  { %3968 = vperm.xlu0 %5416, %v3450_v25  }
 0x3c8   :  { %3980 = vperm.xlu1 %5417, %v3452_v26  }
 0x3cb   :  { %4201 = vperm.xlu0 %5416, %v3464_v28   ;;  %v834_v28 = vpop.permute.xlu1 %833 }
 0x3cc   :  { %4206 = vperm.xlu1 %5417, %v3465_v30  }
 0x3cf   :  { %4211 = vperm.xlu0 %5416, %v3466_v31  }
 0x3d0   :  { %4216 = vperm.xlu1 %5417, %v3467_v32  }
 0x3d3   :  { %4229 = vperm.xlu0 %5416, %v3470_v34  }
 0x3d4   :  { %3973 = vperm.xlu1 %5417, %v3451_v36  }
 0x3d7   :  { %3985 = vperm.xlu0 %5416, %v3453_v37   ;;  %v178_v37 = vld [vmem:[%s6275_s14 + $0x8] sm:$0xff] }
 0x3d8   :  { %4234 = vperm.xlu1 %5417, %v3471_v41   ;;  %v191_v41 = vld [vmem:[%s6276_s19 + $0x10] sm:$0xff] }
 0x485   :  { %v4868_v42 = vpop.f32.mrb[4].mxu0 }
 0x486   :  { %v690_v43 = vmul.f32 0.125, %v4868_v42  ;;  %v670_v44 = vpop.f32.mrb[5].mxu0  ;;  %v1075_v42 = vpop.permute.xlu1 %1074 }
 0x487   :  { %v689_v45 = vmul.f32 0.125, %v670_v44 }
 0x488   :  { %v694_v46 = vadd.f32 1e-05, %v690_v43  ;;  %v1070_v43 = vpop.permute.xlu0 %1069 }
 0x489   :  { %v693_v47 = vadd.f32 1e-05, %v689_v45  ;;  %v4871_v48 = vpop.f32.mrb[6].mxu0 }
 0x48a   :  { %5418 = vrsqrt.f32 %v694_v46  ;;  %v692_v49 = vmul.f32 0.125, %v4871_v48  ;;  %v680_v50 = vpop.f32.mrb[7].mxu0 }
 0x48b   :  { %5420 = vlog2.f32 %v694_v46  ;;  %v691_v51 = vmul.f32 0.125, %v680_v50 }
 0x48c   :  { %5422 = vrsqrt.f32 %v693_v47  ;;  %v696_v52 = vadd.f32 1e-05, %v692_v49  ;;  %v1085_v49 = vpop.permute.xlu1 %1084 }
 0x48d   :  { %5424 = vlog2.f32 %v693_v47  ;;  %v695_v53 = vadd.f32 1e-05, %v691_v51 }
 0x48e   :  { %5426 = vrsqrt.f32 %v696_v52 }
 0x48f   :  { %5428 = vlog2.f32 %v696_v52  ;;  %v1080_v52 = vpop.permute.xlu0 %1079 }
 0x490   :  { %5430 = vrsqrt.f32 %v695_v53 }
 0x491   :  { %5432 = vlog2.f32 %v695_v53 }
 0x494   :  { %v5419_v54 = vpop.eup %5418 }
 0x495   :  { %v5421_v55 = vpop.eup %5420 }
 0x496   :  { %v5423_v56 = vpop.eup %5422  ;;  %v853_v57 = vmul.f32 0.6931472, %v5421_v55 }
 0x497   :  { %v5425_v58 = vpop.eup %5424  ;;  %4874 = vmatprep.mubr.msk.f32.mxu1 %vm397_vm3, %v5423_v56 }
 0x498   :  { %v5427_v59 = vpop.eup %5426  ;;  %v859_v60 = vsel %vm397_vm3, %v853_v57, 0.0  ;;  %v851_v61 = vmul.f32 0.6931472, %v5425_v58  ;;  %4875 = vmatmul.mubr.msk.f32.vlgmr.msra.gmra.mrb[12].mxu1 %vm397_vm3, %v5419_v54 }
 0x499   :  { %v5429_v62 = vpop.eup %5428 }
 0x49a   :  { %v5431_v63 = vpop.eup %5430  ;;  %v858_v0 = vsel %vm397_vm3, %v851_v61, 0.0  ;;  %v857_v1 = vmul.f32 0.6931472, %v5429_v62  ;;  %v192_v61 = vld [vmem:[%s6276_s19 + $0x18] sm:$0xff]  ;;  %v5565_v62 = vmov 0.0|0.0  }
 0x49b   :  { %v5433_v2 = vpop.eup %5432  ;;  %v860_v4 = vadd.f32 %v859_v60, %v858_v0  ;;  %4877 = vmatprep.mubr.msk.f32.mxu1 %vm397_vm3, %v5431_v63  ;;  %v190_v60 = vld [vmem:[%s6276_s19 + $0x8] sm:$0xff]  ;;  %v5567_v63 = vmov 0.0   ;;  %v1098_v0 = vpop.permute.xlu0 %1097 }
 0x49c   :  { %v855_v5 = vmul.f32 0.6931472, %v5433_v2  ;;  %4878 = vmatmul.mubr.msk.f32.gmra.mrb[14].mxu1 %vm397_vm3, %v5427_v59  ;;  %v863_v6 = vsel %vm397_vm3, %v857_v1, 0.0  ;;  %v1103_v1 = vpop.permute.xlu1 %1102 }
 0x49d   :  { %4915 = vmatprep.mubr.msk.f32.mxu1 %vm295_vm1, %v191_v41 }
 0x49e   :  { %v861_v7 = vsel %vm397_vm3, %v855_v5, 0.0 }
 0x49f   :  { %v862_v8 = vadd.f32 %v861_v7, %v860_v4  ;;  %v815_v2 = vpop.permute.xlu0 %814 }
 0x4a0   :  { %v820_v4 = vpop.permute.xlu1 %819 }
 0x4a1   :  { %v5893_v9 = vadd.f32 %v863_v6, %v862_v8 }
 0x4a3   :  { %v839_v5 = vpop.permute.xlu0 %838 }
 0x4a4   :  { %v1108_v6 = vpop.permute.xlu1 %1107 }
 0x4a7   :  { %v844_v13 = vpop.permute.xlu0 %843 }
 0x4a8   :  { %v1113_v14 = vpop.permute.xlu1 %1112 }
 0x56b   :  { %v4876_v21 = vpop.f32.mrb[12].mxu1 }
 0x56c   :  { %v799_v22 = vmul.f32 %v4876_v21, %v5802_v27  ;;  %v779_v23 = vpop.f32.mrb[13].mxu1 }
 0x56d   :  { %v798_v25 = vmul.f32 %v779_v23, %v5804_v29  ;;  %v179_v29 = vld [vmem:[%s6275_s14 + $0x10] sm:$0xff] }
 0x56e   :  { %v823_v26 = vmul.f32 %v810_v24, %v799_v22 }
 0x56f   :  { %v822_v30 = vmul.f32 %v805_v19, %v798_v25  ;;  %v5913_v31 = vpop.f32.mrb[14].mxu1 }
 0x570   :  { %v5915_v32 = vadd.f32 %v834_v28, %v823_v26  ;;  %v5917_v34 = vpop.f32.mrb[15].mxu1  ;;  %v801_v7 = vmul.f32 %v5913_v31, %v5810_v33 }
 0x571   :  { %v5919_v36 = vadd.f32 %v829_v20, %v822_v30  ;;  %v800_v8 = vmul.f32 %v5917_v34, %v5812_v35 }
 0x572   :  { %v825_v10 = vmul.f32 %v820_v4, %v801_v7 }
 0x573   :  { %v5222_v27 = vpack.c.bf16 %v5915_v32, %v5919_v36  ;;  %v824_v11 = vmul.f32 %v815_v2, %v800_v8 }
 0x574   :  { %v849_v19 = vadd.f32 %v844_v13, %v825_v10 }
 0x575   :  { %5223 = vmatprep.subr.bf16.mxu0 %v5222_v27  ;;  %v848_v24 = vadd.f32 %v839_v5, %v824_v11 }
 0x576   :  { %5225 = vmatpush3.bf16.msra.mxu0 %v5222_v27 }
 0x579   :  { %4899 = vmatmul.mubr.msk.f32.vlgmr.msra.gmra.mrb[8].mxu0 %vm197_vm0, %v178_v37 }
 0x57a   :  { %4901 = vmatprep.mubr.msk.f32.mxu0 %vm197_vm0, %v179_v29 }
 0x57d   :  { %4902 = vmatmul.mubr.msk.f32.gmra.mrb[10].mxu0 %vm197_vm0, %v180_v38 }
 0x57e   :  { %4912 = vmatprep.mubr.msk.f32.mxu0 %vm295_vm1, %v189_v39 }
 0x64c   :  { %v4900_v44 = vpop.f32.mrb[8].mxu0 }
 0x64d   :  { %v1088_v45 = vadd.f32 %v4900_v44, %v1075_v42  ;;  %v1048_v46 = vpop.f32.mrb[9].mxu0 }
 0x64e   :  { %v1087_v47 = vadd.f32 %v1070_v43, %v1048_v46 }
 0x64f   :  { %v1092_v48 = vmax.f32 %v1088_v45, 0.0 }
 0x650   :  { %v1091_v50 = vmax.f32 %v1087_v47, 0.0  ;;  %v4903_v51 = vpop.f32.mrb[10].mxu0 }
 0x651   :  { %v1090_v53 = vadd.f32 %v4903_v51, %v1085_v49  ;;  %v1058_v54 = vpop.f32.mrb[11].mxu0 }
 0x652   :  { %v5226_v55 = vpack.c.bf16 %v1092_v48, %v1091_v50  ;;  %v1089_v56 = vadd.f32 %v1080_v52, %v1058_v54 }
 0x653   :  { %v1094_v57 = vmax.f32 %v1090_v53, 0.0 }
 0x654   :  { %v1093_v58 = vmax.f32 %v1089_v56, 0.0  ;;  %5227 = vmatprep.subr.bf16.mxu0 %v5226_v55  ;;  %5354 = vmatprep.subr.bf16.mxu1 %v5226_v55 }
 0x655   :  { %5229 = vmatpush3.bf16.msra.mxu0 %v5226_v55  ;;  %5356 = vmatpush3.bf16.msra.mxu1 %v5226_v55 }
 0x656   :  { %v5230_v59 = vpack.c.bf16 %v1094_v57, %v1093_v58 }
 0x658   :  { %5231 = vmatprep.subr.bf16.mxu0 %v5230_v59  ;;  %5355 = vmatprep.subr.bf16.mxu1 %v5230_v59 }
 0x659   :  { %5233 = vmatpush3.bf16.msra.mxu0 %v5230_v59  ;;  %5357 = vmatpush3.bf16.msra.mxu1 %v5230_v59 }
 0x65a   :  { %5238 = vmatprep.subr.bf16.mxu0 %v5767_v3  ;;  %5234 = vmatprep.subr.bf16.mxu1 %v5565_v62 }
 0x65c   :  { %4913 = vmatmul.mubr.msk.f32.vlgmr.msra.gmra.mrb[12].mxu0 %vm295_vm1, %v190_v60  ;;  %4916 = vmatmul.mubr.msk.f32.vlgmr.msra.gmra.mrb[16].mxu1 %vm295_vm1, %v192_v61 }
 0x65d   :  { %5240 = vmatpush3.bf16.msra.mxu0 %v5767_v3  ;;  %4929 = vmatprep.mubr.msk.f32.mxu0 %vm197_vm0, %v5919_v36 }
 0x65e   :  { %4949 = vmatprep.subr.msk.mxu0 %vm410_vm2, %v5789_v17  ;;  %5236 = vmatpush3.bf16.msra.mxu1 %v5767_v3 }
 0x65f   :  { %4922 = vmatprep.mubr.msk.f32.mxu1 %vm5566_vm4, %v5567_v63 }
 0x660   :  { %4930 = vmatmul.mubr.msk.f32.vlgmr.msra.gmra.mrb[14].mxu0 %vm197_vm0, %v5915_v32 }
 0x661   :  { %4950 = vmatpush3.msk.msra.mxu0 %vm410_vm2, %v5789_v17 }
 0x72f   :  { %v4914_v15 = vpop.f32.mrb[12].mxu0  ;;  %v4917_v16 = vpop.f32.mrb[16].mxu1 }
 0x730   :  { %v1199_v18 = vadd.f32 %v4914_v15, %v1103_v1  ;;  %v1209_v20 = vadd.f32 %v4917_v16, %v1113_v14  ;;  %v1193_v21 = vpop.f32.mrb[13].mxu0  ;;  %v1203_v22 = vpop.f32.mrb[17].mxu1  ;;  %v1335_v14 = vld [vmem:[%s6277_s24] sm:$0xff]  ;;  %v865_v15 = vrot.slane %v5893_v9, 4 }
 0x731   :  { %v1194_v23 = vadd.f32 %v1193_v21, %v1098_v0  ;;  %v1204_v25 = vadd.f32 %v1203_v22, %v1108_v6 }
 0x732   :  { %v1213_v26 = vadd.f32 2.0, %v1199_v18  ;;  %v1241_v28 = vadd.f32 %v1209_v20, %v849_v19  ;;  %v866_v16 = vadd.f32 %v865_v15, %v5893_v9  ;;  %v1338_v9 = vld [vmem:[%s6277_s24 + $0x18] sm:$0xff] }
 0x733   :  { %v1212_v33 = vadd.f32 2.0, %v1194_v23  ;;  %v1240_v30 = vadd.f32 %v1204_v25, %v848_v24  ;;  %v4931_v31 = vpop.f32.mrb[14].mxu0 }
 0x734   :  { %v1219_v35 = vand.u32 2147483647, %v1213_v26  ;;  %v1437_v34 = vpop.f32.mrb[15].mxu0  ;;  %v1215_v46 = vsub.f32 0.0, %v1213_v26  ;;  %v867_v18 = vrot.slane %v866_v16, 2 }
 0x735   :  { %v1218_v27 = vand.u32 2147483647, %v1212_v33  ;;  %v5241_v37 = vpack.c.bf16 %v4931_v31, %v1437_v34  ;;  %v1214_v47 = vsub.f32 0.0, %v1212_v33  ;;  %v1336_v31 = vld [vmem:[%s6277_s24 + $0x8] sm:$0xff] }
 0x736   :  { %v1221_v29 = vsub.f32 0.0, %v1219_v35  ;;  %v1217_v50 = vmax.f32 %v1215_v46, 0.0  ;;  %v868_v19 = vadd.f32 %v867_v18, %v866_v16  ;;  %v1337_v35 = vld [vmem:[%s6277_s24 + $0x10] sm:$0xff] }
 0x737   :  { %v1220_v38 = vsub.f32 0.0, %v1218_v27  ;;  %5242 = vmatprep.subr.bf16.mxu1 %v5241_v37  ;;  %v1216_v52 = vmax.f32 %v1214_v47, 0.0 }
 0x738   :  { %v1224_v39 = vmul.f32 1.442695, %v1221_v29  ;;  %v869_v20 = vrot.slane %v868_v19, 1 }
 0x739   :  { %v1222_v41 = vmul.f32 1.442695, %v1220_v38 }
 0x73a   :  { %5434 = vpow2.f32 %v1224_v39  ;;  %v870_v21 = vadd.f32 %v869_v20, %v868_v19 }
 0x73b   :  { %5436 = vpow2.f32 %v1222_v41 }
 0x73c   :  { %v871_v22 = vmul.f32 0.5, %v870_v21 }
 0x73e   :  { %v872_v23 = vsub.f32 0.0, %v871_v22 }
 0x744   :  { %v5435_v42 = vpop.eup %5434 }
 0x745   :  { %v5437_v43 = vpop.eup %5436  ;;  %v1227_v44 = vadd.f32 1.0, %v5435_v42 }
 0x746   :  { %v1226_v45 = vadd.f32 1.0, %v5437_v43 }
 0x747   :  { %5438 = vlog2.f32 %v1227_v44 }
 0x748   :  { %5440 = vlog2.f32 %v1226_v45 }
 0x751   :  { %v5439_v48 = vpop.eup %5438 }
 0x752   :  { %v5441_v49 = vpop.eup %5440  ;;  %v1231_v51 = vmul.f32 0.6931472, %v5439_v48 }
 0x753   :  { %v1229_v53 = vmul.f32 0.6931472, %v5441_v49 }
 0x754   :  { %v1233_v54 = vadd.f32 %v1231_v51, %v1217_v50 }
 0x755   :  { %v1232_v55 = vadd.f32 %v1229_v53, %v1216_v52 }
 0x756   :  { %v1235_v56 = vsub.f32 0.0, %v1233_v54 }
 0x757   :  { %v1234_v57 = vsub.f32 0.0, %v1232_v55 }
 0x758   :  { %v1238_v58 = vmul.f32 1.442695, %v1235_v56  ;;  %v1245_v59 = vsel %vm197_vm0, %v1235_v56, 0.0 }
 0x759   :  { %v1236_v60 = vmul.f32 1.442695, %v1234_v57  ;;  %v1244_v61 = vsel %vm197_vm0, %v1234_v57, 0.0 }
 0x75a   :  { %5442 = vpow2.f32 %v1238_v58  ;;  %v1246_v0 = vadd.f32 %v1245_v59, %v1244_v61 }
 0x75b   :  { %5444 = vpow2.f32 %v1236_v60 }
 0x75c   :  { %v1247_v1 = vrot.slane %v1246_v0, 4 }
 0x75e   :  { %v1248_v2 = vadd.f32 %v1247_v1, %v1246_v0 }
 0x760   :  { %v1249_v4 = vrot.slane %v1248_v2, 2 }
 0x762   :  { %v1250_v5 = vadd.f32 %v1249_v4, %v1248_v2 }
 0x764   :  { %v5443_v6 = vpop.eup %5442  ;;  %v1251_v7 = vrot.slane %v1250_v5, 1 }
 0x765   :  { %v5445_v8 = vpop.eup %5444  ;;  %v1243_v10 = vmul.f32 %v5443_v6, %v1241_v28 }
 0x766   :  { %v1242_v11 = vmul.f32 %v5445_v8, %v1240_v30  ;;  %v1252_v13 = vadd.f32 %v1251_v7, %v1250_v5 }
 0x768   :  { %4923 = vmatmul.mubr.msk.f32.vlgmr.msra.gmra.mrb[18].mxu1 %vm197_vm0, %v1252_v13  ;;  %4932 = vmatprep.mubr.msk.f32.mxu0 %vm197_vm0, %v1242_v11 }
 0x769   :  { %5244 = vmatpush3.bf16.msra.mxu1 %v5241_v37  ;;  %4933 = vmatmul.mubr.msk.f32.gmra.mrb[16].mxu0 %vm197_vm0, %v1243_v10 }
 0x76a   :  { %4943 = vmatprep.mubr.msk.f32.mxu1 %vm295_vm1, %v1335_v14 }
 0x83b   :  { %v1322_v24 = vpop.f32.mrb[18].mxu1 }
 0x83c   :  { %v5964_v25 = vadd.f32 %v1322_v24, %v872_v23  ;;  %v4924_v26 = vpop.f32.mrb[19].mxu1  ;;  %v4934_v28 = vpop.f32.mrb[16].mxu0 }
 0x83d   :  { %v1447_v33 = vpop.f32.mrb[17].mxu0 }
 0x83e   :  { %v5245_v30 = vpack.c.bf16 %v4934_v28, %v1447_v33 }
 0x840   :  { %5246 = vmatprep.subr.bf16.mxu1 %v5245_v30 }
 0x841   :  { %5248 = vmatpush3.bf16.msra.mxu1 %v5245_v30 }
 0x842   :  { %5250 = vmatprep.subr.bf16.mxu1 %v5767_v3 }
 0x844   :  { %4944 = vmatmul.mubr.msk.f32.vlgmr.msra.gmra.mrb[20].mxu1 %vm295_vm1, %v1336_v31 }
 0x845   :  { %4946 = vmatprep.mubr.msk.f32.mxu1 %vm295_vm1, %v1337_v35  ;;  %5252 = vmatpush3.bf16.msra.mxu1 %v5767_v3 }
 0x846   :  { %4981 = vmatprep.subr.msk.mxu1 %vm410_vm2, %v5789_v17 }
 0x848   :  { %4947 = vmatmul.mubr.msk.f32.gmra.mrb[22].mxu1 %vm295_vm1, %v1338_v9 }
 0x917   :  { %v4945_v34 = vpop.f32.mrb[20].mxu1 }
 0x918   :  { %v1534_v27 = vpop.f32.mrb[21].mxu1  ;;  %v1554_v29 = vmul.f32 0.125, %v4945_v34 }
 0x919   :  { %v1553_v37 = vmul.f32 0.125, %v1534_v27 }
 0x91b   :  { %v4948_v38 = vpop.f32.mrb[22].mxu1  ;;  %4951 = vmatprep.mubr.msk.f32.mxu0 %vm397_vm3, %v1553_v37 }
 0x91c   :  { %v1544_v39 = vpop.f32.mrb[23].mxu1  ;;  %4952 = vmatmul.mubr.msk.f32.vlgmr.msra.gmra.mrb[18].mxu0 %vm397_vm3, %v1554_v29  ;;  %v1556_v42 = vmul.f32 0.125, %v4948_v38 }
 0x91d   :  { %v1555_v41 = vmul.f32 0.125, %v1544_v39 }
 0x91f   :  { %4954 = vmatprep.mubr.msk.f32.mxu0 %vm397_vm3, %v1555_v41 }
 0x920   :  { %4955 = vmatmul.mubr.msk.f32.gmra.mrb[20].mxu0 %vm397_vm3, %v1556_v42  ;;  %v1343_v42 = vld [vmem:[%s6278_s30] sm:$0xff] }
 0x921   :  { %4975 = vmatprep.mubr.msk.f32.mxu0 %vm295_vm1, %v1335_v14 }
 0x9ef   :  { %v4953_v43 = vpop.f32.mrb[18].mxu0 }
 0x9f0   :  { %v5982_v44 = vsub.f32 %v5915_v32, %v4953_v43  ;;  %v1635_v45 = vpop.f32.mrb[19].mxu0  ;;  %v1344_v43 = vld [vmem:[%s6278_s30 + $0x8] sm:$0xff] }
 0x9f1   :  { %v5985_v46 = vsub.f32 %v5919_v36, %v1635_v45  ;;  %v1345_v45 = vld [vmem:[%s6278_s30 + $0x10] sm:$0xff] }
 0x9f2   :  { %v1659_v49 = vmul.f32 %v5982_v44, %v5982_v44 }
 0x9f3   :  { %v1658_v47 = vmul.f32 %v5985_v46, %v5985_v46  ;;  %v4956_v48 = vpop.f32.mrb[20].mxu0 }
 0x9f4   :  { %v5991_v50 = vsub.f32 %v1243_v10, %v4956_v48  ;;  %v1645_v51 = vpop.f32.mrb[21].mxu0  ;;  %v1339_v48 = vld [vmem:[%s6279_s6] sm:$0xff] }
 0x9f5   :  { %v5993_v52 = vsub.f32 %v1242_v11, %v1645_v51  ;;  %4961 = vmatprep.mubr.msk.f32.mxu1 %vm197_vm0, %v1658_v47  ;;  %v1346_v47 = vld [vmem:[%s6278_s30 + $0x18] sm:$0xff]  ;;  %v1960_v51 = vpop.permute.xlu0 %1959 }
 0x9f6   :  { %4962 = vmatmul.mubr.msk.f32.vlgmr.msra.gmra.mrb[24].mxu1 %vm197_vm0, %v1659_v49  ;;  %v1661_v36 = vmul.f32 %v5991_v50, %v5991_v50  ;;  %v1965_v49 = vpop.permute.xlu1 %1964 }
 0x9f7   :  { %v1660_v32 = vmul.f32 %v5993_v52, %v5993_v52  ;;  %4982 = vmatpush3.msk.msra.mxu1 %vm410_vm2, %v5789_v17 }
 0x9f9   :  { %4964 = vmatprep.mubr.msk.f32.mxu1 %vm197_vm0, %v1660_v32 }
 0x9fa   :  { %4965 = vmatmul.mubr.msk.f32.gmra.mrb[26].mxu1 %vm197_vm0, %v1661_v36 }
 0xac9   :  { %v4963_v53 = vpop.f32.mrb[24].mxu1 }
 0xaca   :  { %v1740_v54 = vpop.f32.mrb[25].mxu1 }
 0xacb   :  { %v5253_v55 = vpack.c.bf16 %v4963_v53, %v1740_v54 }
 0xacd   :  { %v4966_v56 = vpop.f32.mrb[26].mxu1  ;;  %5254 = vmatprep.subr.bf16.mxu0 %v5253_v55 }
 0xace   :  { %v1750_v57 = vpop.f32.mrb[27].mxu1  ;;  %5256 = vmatpush3.bf16.msra.mxu0 %v5253_v55 }
 0xacf   :  { %v5257_v58 = vpack.c.bf16 %v4966_v56, %v1750_v57  ;;  %v1989_v56 = vpop.permute.xlu1 %1988 }
 0xad1   :  { %5258 = vmatprep.subr.bf16.mxu0 %v5257_v58 }
 0xad2   :  { %5260 = vmatpush3.bf16.msra.mxu0 %v5257_v58 }
 0xad3   :  { %5262 = vmatprep.subr.bf16.mxu0 %v5880_v40 }
 0xad5   :  { %4976 = vmatmul.mubr.msk.f32.vlgmr.msra.gmra.mrb[22].mxu0 %vm295_vm1, %v1336_v31 }
 0xad6   :  { %4978 = vmatprep.mubr.msk.f32.mxu0 %vm295_vm1, %v1337_v35  ;;  %5264 = vmatpush3.bf16.msra.mxu0 %v5880_v40 }
 0xad7   :  { %5266 = vmatprep.subr.bf16.mxu0 %v5897_v12 }
 0xad9   :  { %4979 = vmatmul.mubr.msk.f32.gmra.mrb[24].mxu0 %vm295_vm1, %v1338_v9 }
 0xada   :  { %5268 = vmatpush3.bf16.msra.mxu0 %v5897_v12  ;;  %4997 = vmatprep.mubr.msk.f32.mxu0 %vm295_vm1, %v1343_v42 }
 0xadd   :  { %4998 = vmatmul.mubr.msk.f32.vlgmr.msra.gmra.mrb[26].mxu0 %vm295_vm1, %v1344_v43 }
 0xade   :  { %5000 = vmatprep.mubr.msk.f32.mxu0 %vm295_vm1, %v1345_v45 }
 0xae1   :  { %5001 = vmatmul.mubr.msk.f32.gmra.mrb[28].mxu0 %vm295_vm1, %v1346_v47 }
 0xae2   :  { %5007 = vmatprep.mubr.msk.f32.mxu0 %vm197_vm0, %v1339_v48 }
 0xba8   :  { %v4977_v17 = vpop.f32.mrb[22].mxu0 }
 0xba9   :  { %v1845_v59 = vmul.f32 0.125, %v4977_v17  ;;  %v1825_v60 = vpop.f32.mrb[23].mxu0  ;;  %v1984_v17 = vpop.permute.xlu0 %1983 }
 0xbaa   :  { %v1844_v61 = vmul.f32 0.125, %v1825_v60 }
 0xbab   :  { %v1849_v0 = vadd.f32 1e-05, %v1845_v59 }
 0xbac   :  { %v1848_v1 = vadd.f32 1e-05, %v1844_v61  ;;  %v4980_v2 = vpop.f32.mrb[24].mxu0 }
 0xbad   :  { %5446 = vrsqrt.f32 %v1849_v0  ;;  %v1847_v4 = vmul.f32 0.125, %v4980_v2  ;;  %v1835_v5 = vpop.f32.mrb[25].mxu0  ;;  %v6048_v2 = vld [vmem:[%s5592_s17] sm:$0x3]  ;;  %s6281_s17 = sld [smem:[#allocation13_spill]] }
 0xbae   :  { %5448 = vlog2.f32 %v1849_v0  ;;  %v1846_v6 = vmul.f32 0.125, %v1835_v5  ;;  %v1340_v0 = vld [vmem:[%s6279_s6 + $0x8] sm:$0xff]  ;;  %v2230_v5 = vpop.permute.xlu1 %2229 }
 0xbaf   :  { %5450 = vrsqrt.f32 %v1848_v1  ;;  %v1851_v7 = vadd.f32 1e-05, %v1847_v4  ;;  %v1351_v4 = vld [vmem:[%s6280_s20] sm:$0xff] }
 0xbb0   :  { %5452 = vlog2.f32 %v1848_v1  ;;  %v1850_v8 = vadd.f32 1e-05, %v1846_v6  ;;  %v1342_v1 = vld [vmem:[%s6279_s6 + $0x18] sm:$0xff]  ;;  %v2225_v6 = vpop.permute.xlu0 %2224 }
 0xbb1   :  { %5454 = vrsqrt.f32 %v1851_v7 }
 0xbb2   :  { %5456 = vlog2.f32 %v1851_v7 }
 0xbb3   :  { %5458 = vrsqrt.f32 %v1850_v8 }
 0xbb4   :  { %5460 = vlog2.f32 %v1850_v8 }
 0xbb7   :  { %v5447_v10 = vpop.eup %5446 }
 0xbb8   :  { %v5449_v11 = vpop.eup %5448 }
 0xbb9   :  { %v5451_v13 = vpop.eup %5450  ;;  %v2008_v14 = vmul.f32 0.6931472, %v5449_v11 }
 0xbba   :  { %v5453_v15 = vpop.eup %5452  ;;  %4983 = vmatprep.mubr.msk.f32.mxu1 %vm397_vm3, %v5451_v13 }
 0xbbb   :  { %v5455_v16 = vpop.eup %5454  ;;  %v2014_v18 = vsel %vm397_vm3, %v2008_v14, 0.0  ;;  %v2006_v19 = vmul.f32 0.6931472, %v5453_v15  ;;  %4984 = vmatmul.mubr.msk.f32.vlgmr.msra.gmra.mrb[28].mxu1 %vm397_vm3, %v5447_v10  ;;  %v2240_v14 = vpop.permute.xlu1 %2239 }
 0xbbc   :  { %v5457_v20 = vpop.eup %5456 }
 0xbbd   :  { %v5459_v21 = vpop.eup %5458  ;;  %v2013_v22 = vsel %vm397_vm3, %v2006_v19, 0.0  ;;  %v2012_v23 = vmul.f32 0.6931472, %v5457_v20 }
 0xbbe   :  { %v5461_v24 = vpop.eup %5460  ;;  %v2015_v26 = vadd.f32 %v2014_v18, %v2013_v22  ;;  %4986 = vmatprep.mubr.msk.f32.mxu1 %vm397_vm3, %v5459_v21  ;;  %v2235_v18 = vpop.permute.xlu0 %2234 }
 0xbbf   :  { %v2010_v28 = vmul.f32 0.6931472, %v5461_v24  ;;  %4987 = vmatmul.mubr.msk.f32.gmra.mrb[30].mxu1 %vm397_vm3, %v5455_v16  ;;  %v2018_v33 = vsel %vm397_vm3, %v2012_v23, 0.0 }
 0xbc0   :  { %5021 = vmatprep.mubr.msk.f32.mxu1 %vm295_vm1, %v1351_v4 }
 0xbc1   :  { %v2016_v30 = vsel %vm397_vm3, %v2010_v28, 0.0  ;;  %v1352_v28 = vld [vmem:[%s6280_s20 + $0x8] sm:$0xff] }
 0xbc2   :  { %v2017_v31 = vadd.f32 %v2016_v30, %v2015_v26  ;;  %v1354_v30 = vld [vmem:[%s6280_s20 + $0x18] sm:$0xff] }
 0xbc4   :  { %v2019_v35 = vadd.f32 %v2018_v33, %v2017_v31  ;;  %v1353_v33 = vld [vmem:[%s6280_s20 + $0x10] sm:$0xff]  ;;  %v2253_v31 = vpop.permute.xlu0 %2252 }
 0xbc6   :  { %v2020_v9 = vrot.slane %v2019_v35, 4 }
 0xbc8   :  { %v2021_v34 = vadd.f32 %v2020_v9, %v2019_v35  ;;  %v2258_v35 = vpop.permute.xlu1 %2257  ;;  %v1970_v9 = vpop.permute.xlu0 %1969 }
 0xbca   :  { %v2022_v27 = vrot.slane %v2021_v34, 2 }
 0xbcc   :  { %v2023_v37 = vadd.f32 %v2022_v27, %v2021_v34  ;;  %v1975_v34 = vpop.permute.xlu1 %1974  ;;  %v1994_v27 = vpop.permute.xlu0 %1993 }
 0xbce   :  { %v2024_v29 = vrot.slane %v2023_v37, 1 }
 0xbd0   :  { %v2025_v38 = vadd.f32 %v2024_v29, %v2023_v37  ;;  %v2263_v29 = vpop.permute.xlu1 %2262 }
 0xbd2   :  { %v6020_v39 = vmul.f32 0.5, %v2025_v38 }
 0xbd4   :  { %v2027_v41 = vsub.f32 %v5964_v25, %v6020_v39 }
 0xc8e   :  { %v4985_v32 = vpop.f32.mrb[28].mxu1 }
 0xc8f   :  { %v1954_v36 = vmul.f32 %v4985_v32, %v5982_v44  ;;  %v1934_v53 = vpop.f32.mrb[29].mxu1 }
 0xc90   :  { %v1953_v54 = vmul.f32 %v1934_v53, %v5985_v46  ;;  %v1341_v46 = vld [vmem:[%s6279_s6 + $0x10] sm:$0xff] }
 0xc91   :  { %v1978_v55 = vmul.f32 %v1965_v49, %v1954_v36  ;;  %v2268_v36 = vpop.permute.xlu1 %2267 }
 0xc92   :  { %v1977_v57 = vmul.f32 %v1960_v51, %v1953_v54  ;;  %v4988_v58 = vpop.f32.mrb[30].mxu1  ;;  %v1999_v51 = vpop.permute.xlu0 %1998 }
 0xc93   :  { %v2002_v59 = vadd.f32 %v1989_v56, %v1978_v55  ;;  %v1944_v60 = vpop.f32.mrb[31].mxu1  ;;  %v1956_v37 = vmul.f32 %v4988_v58, %v5991_v50 }
 0xc94   :  { %v2001_v61 = vadd.f32 %v1984_v17, %v1977_v57  ;;  %v1955_v38 = vmul.f32 %v1944_v60, %v5993_v52 }
 0xc95   :  { %2505 = vst.msk [vmem:[%s5757_s8 + $0x8] sm:$0xff] %vm197_vm0, %v2002_v59  ;;  %v1980_v43 = vmul.f32 %v1975_v34, %v1956_v37 }
 0xc96   :  { %2504 = vst.msk [vmem:[%s5757_s8] sm:$0xff] %vm197_vm0, %v2001_v61  ;;  %v5269_v44 = vpack.c.bf16 %v2002_v59, %v2001_v61  ;;  %v1979_v48 = vmul.f32 %v1970_v9, %v1955_v38 }
 0xc97   :  { %v2004_v56 = vadd.f32 %v1999_v51, %v1980_v43 }
 0xc98   :  { %5270 = vmatprep.subr.bf16.mxu0 %v5269_v44  ;;  %v2003_v50 = vadd.f32 %v1994_v27, %v1979_v48 }
 0xc99   :  { %5272 = vmatpush3.bf16.msra.mxu0 %v5269_v44 }
 0xc9a   :  { %5285 = vmatprep.subr.bf16.mxu0 %v5767_v3 }
 0xc9c   :  { %5008 = vmatmul.mubr.msk.f32.vlgmr.msra.gmra.mrb[26].mxu0 %vm197_vm0, %v1340_v0 }
 0xc9d   :  { %5010 = vmatprep.mubr.msk.f32.mxu0 %vm197_vm0, %v1341_v46  ;;  %5287 = vmatpush3.bf16.msra.mxu0 %v5767_v3 }
 0xc9e   :  { %5048 = vmatprep.subr.msk.mxu0 %vm410_vm2, %v6048_v2 }
 0xca0   :  { %5011 = vmatmul.mubr.msk.f32.gmra.mrb[28].mxu0 %vm197_vm0, %v1342_v1 }
 0xd6f   :  { %v5009_v7 = vpop.f32.mrb[26].mxu0 }
 0xd70   :  { %v2243_v8 = vadd.f32 %v5009_v7, %v2230_v5  ;;  %v2203_v10 = vpop.f32.mrb[27].mxu0 }
 0xd71   :  { %v2242_v11 = vadd.f32 %v2225_v6, %v2203_v10 }
 0xd72   :  { %v2247_v13 = vmax.f32 %v2243_v8, 0.0 }
 0xd73   :  { %v2246_v15 = vmax.f32 %v2242_v11, 0.0  ;;  %v5012_v16 = vpop.f32.mrb[28].mxu0 }
 0xd74   :  { %v2245_v19 = vadd.f32 %v5012_v16, %v2240_v14  ;;  %v2213_v20 = vpop.f32.mrb[29].mxu0 }
 0xd75   :  { %v5273_v21 = vpack.c.bf16 %v2247_v13, %v2246_v15  ;;  %v2244_v22 = vadd.f32 %v2235_v18, %v2213_v20 }
 0xd76   :  { %v2249_v23 = vmax.f32 %v2245_v19, 0.0 }
 0xd77   :  { %v2248_v24 = vmax.f32 %v2244_v22, 0.0  ;;  %5274 = vmatprep.subr.bf16.mxu1 %v5273_v21 }
 0xd78   :  { %5276 = vmatpush3.bf16.msra.mxu1 %v5273_v21 }
 0xd79   :  { %v5277_v26 = vpack.c.bf16 %v2249_v23, %v2248_v24 }
 0xd7b   :  { %5278 = vmatprep.subr.bf16.mxu1 %v5277_v26 }
 0xd7c   :  { %5280 = vmatpush3.bf16.msra.mxu1 %v5277_v26 }
 0xd7d   :  { %5281 = vmatprep.subr.bf16.mxu1 %v5565_v62 }
 0xd7f   :  { %5022 = vmatmul.mubr.msk.f32.vlgmr.msra.gmra.mrb[32].mxu1 %vm295_vm1, %v1352_v28 }
 0xd80   :  { %5024 = vmatprep.mubr.msk.f32.mxu1 %vm295_vm1, %v1353_v33  ;;  %5283 = vmatpush3.bf16.msra.mxu1 %v5767_v3 }
 0xd83   :  { %5025 = vmatmul.mubr.msk.f32.gmra.mrb[34].mxu1 %vm295_vm1, %v1354_v30 }
 0xd84   :  { %5031 = vmatprep.mubr.msk.f32.mxu1 %vm5566_vm4, %v5567_v63 }
 0xe52   :  { %v5023_v42 = vpop.f32.mrb[32].mxu1 }
 0xe53   :  { %v2354_v45 = vadd.f32 %v5023_v42, %v2258_v35  ;;  %v2348_v47 = vpop.f32.mrb[33].mxu1  ;;  %v2486_v42 = vld [vmem:[%s6281_s17] sm:$0xff] }
 0xe54   :  { %v2349_v49 = vadd.f32 %v2348_v47, %v2253_v31 }
 0xe55   :  { %v2368_v32 = vadd.f32 2.0, %v2354_v45 }
 0xe56   :  { %v2367_v53 = vadd.f32 2.0, %v2349_v49  ;;  %v5026_v54 = vpop.f32.mrb[34].mxu1 }
 0xe57   :  { %v2374_v55 = vand.u32 2147483647, %v2368_v32  ;;  %v2364_v57 = vadd.f32 %v5026_v54, %v2268_v36  ;;  %v2358_v17 = vpop.f32.mrb[35].mxu1  ;;  %v2370_v7 = vsub.f32 0.0, %v2368_v32  ;;  %v2487_v32 = vld [vmem:[%s6281_s17 + $0x8] sm:$0xff] }
 0xe58   :  { %v2373_v59 = vand.u32 2147483647, %v2367_v53  ;;  %v2359_v58 = vadd.f32 %v2358_v17, %v2263_v29  ;;  %v2369_v8 = vsub.f32 0.0, %v2367_v53 }
 0xe59   :  { %v2376_v61 = vsub.f32 0.0, %v2374_v55  ;;  %v2396_v52 = vadd.f32 %v2364_v57, %v2004_v56  ;;  %v2372_v13 = vmax.f32 %v2370_v7, 0.0 }
 0xe5a   :  { %v2375_v60 = vsub.f32 0.0, %v2373_v59  ;;  %v2395_v44 = vadd.f32 %v2359_v58, %v2003_v50  ;;  %v2371_v15 = vmax.f32 %v2369_v8, 0.0 }
 0xe5b   :  { %v2379_v0 = vmul.f32 1.442695, %v2376_v61 }
 0xe5c   :  { %v2377_v46 = vmul.f32 1.442695, %v2375_v60 }
 0xe5d   :  { %5462 = vpow2.f32 %v2379_v0 }
 0xe5e   :  { %5464 = vpow2.f32 %v2377_v46 }
 0xe67   :  { %v5463_v1 = vpop.eup %5462 }
 0xe68   :  { %v5465_v4 = vpop.eup %5464  ;;  %v2382_v5 = vadd.f32 1.0, %v5463_v1 }
 0xe69   :  { %v2381_v6 = vadd.f32 1.0, %v5465_v4 }
 0xe6a   :  { %5466 = vlog2.f32 %v2382_v5 }
 0xe6b   :  { %5468 = vlog2.f32 %v2381_v6 }
 0xe74   :  { %v5467_v10 = vpop.eup %5466 }
 0xe75   :  { %v5469_v11 = vpop.eup %5468  ;;  %v2386_v14 = vmul.f32 0.6931472, %v5467_v10 }
 0xe76   :  { %v2384_v16 = vmul.f32 0.6931472, %v5469_v11 }
 0xe77   :  { %v2388_v18 = vadd.f32 %v2386_v14, %v2372_v13 }
 0xe78   :  { %v2387_v19 = vadd.f32 %v2384_v16, %v2371_v15 }
 0xe79   :  { %v2390_v20 = vsub.f32 0.0, %v2388_v18 }
 0xe7a   :  { %v2389_v21 = vsub.f32 0.0, %v2387_v19 }
 0xe7b   :  { %v2393_v22 = vmul.f32 1.442695, %v2390_v20  ;;  %v2400_v23 = vsel %vm197_vm0, %v2390_v20, 0.0 }
 0xe7c   :  { %v2391_v24 = vmul.f32 1.442695, %v2389_v21  ;;  %v2399_v26 = vsel %vm197_vm0, %v2389_v21, 0.0 }
 0xe7d   :  { %5470 = vpow2.f32 %v2393_v22  ;;  %v2401_v28 = vadd.f32 %v2400_v23, %v2399_v26  ;;  %v2492_v23 = vld [vmem:[%s6282_s27] sm:$0xff]  ;;  %v2494_v26 = vld [vmem:[%s6282_s27 + $0x10] sm:$0xff] }
 0xe7e   :  { %5472 = vpow2.f32 %v2391_v24  ;;  %v2493_v24 = vld [vmem:[%s6282_s27 + $0x8] sm:$0xff] }
 0xe7f   :  { %v2402_v33 = vrot.slane %v2401_v28, 4 }
 0xe81   :  { %v2403_v30 = vadd.f32 %v2402_v33, %v2401_v28  ;;  %v2495_v28 = vld [vmem:[%s6282_s27 + $0x18] sm:$0xff]  ;;  %v2488_v33 = vld [vmem:[%s6283_s4] sm:$0xff] }
 0xe83   :  { %v2404_v31 = vrot.slane %v2403_v30, 2 }
 0xe85   :  { %v2405_v35 = vadd.f32 %v2404_v31, %v2403_v30 }
 0xe87   :  { %v5471_v9 = vpop.eup %5470  ;;  %v2406_v34 = vrot.slane %v2405_v35, 1 }
 0xe88   :  { %v5473_v27 = vpop.eup %5472  ;;  %v2398_v37 = vmul.f32 %v5471_v9, %v2396_v52  ;;  %v3003_v9 = vpop.permute.xlu0 %3002 }
 0xe89   :  { %v2407_v29 = vadd.f32 %v2406_v34, %v2405_v35  ;;  %v2397_v38 = vmul.f32 %v5473_v27, %v2395_v44  ;;  %v3015_v27 = vpop.permute.xlu1 %3014 }
 0xe8b   :  { %5032 = vmatmul.mubr.msk.f32.vlgmr.msra.gmra.mrb[36].mxu1 %vm197_vm0, %v2407_v29  ;;  %5038 = vmatprep.mubr.msk.f32.mxu0 %vm197_vm0, %v2397_v38  ;;  %v2489_v29 = vld [vmem:[%s6283_s4 + $0x8] sm:$0xff] }
 0xe8c   :  { %5039 = vmatmul.mubr.msk.f32.vlgmr.msra.gmra.mrb[30].mxu0 %vm197_vm0, %v2398_v37  ;;  %5045 = vmatprep.mubr.msk.f32.mxu1 %vm197_vm0, %v2486_v42 }
 0xe8d   :  { %5049 = vmatpush3.msk.msra.mxu0 %vm410_vm2, %v6048_v2 }
 0xf5e   :  { %v2477_v43 = vpop.f32.mrb[36].mxu1 }
 0xf5f   :  { %v6079_v45 = vadd.f32 %v2477_v43, %v2027_v41  ;;  %v5033_v47 = vpop.f32.mrb[37].mxu1  ;;  %v5040_v48 = vpop.f32.mrb[30].mxu0  ;;  %v2500_v43 = vld [vmem:[%s6284_s7] sm:$0xff] }
 0xf60   :  { %v2578_v49 = vpop.f32.mrb[31].mxu0  ;;  %v3242_v47 = vpop.permute.xlu1 %3241 }
 0xf61   :  { %v5288_v51 = vpack.c.bf16 %v5040_v48, %v2578_v49  ;;  %v3237_v48 = vpop.permute.xlu0 %3236 }
 0xf63   :  { %5289 = vmatprep.subr.bf16.mxu1 %v5288_v51 }
 0xf64   :  { %5291 = vmatpush3.bf16.msra.mxu1 %v5288_v51 }
 0xf65   :  { %5293 = vmatprep.subr.bf16.mxu1 %v5767_v3 }
 0xf67   :  { %5046 = vmatmul.mubr.msk.f32.vlgmr.msra.gmra.mrb[38].mxu1 %vm197_vm0, %v2487_v32 }
 0xf68   :  { %5295 = vmatpush3.bf16.msra.mxu1 %v5767_v3 }
 0xf69   :  { %5067 = vmatprep.subr.msk.mxu1 %vm410_vm2, %v6048_v2 }
0x103a   :  { %v5047_v36 = vpop.f32.mrb[38].mxu1 }
0x103b   :  { %v2659_v25 = vpop.f32.mrb[39].mxu1  ;;  %v2669_v41 = vmul.f32 0.125, %v5047_v36 }
0x103c   :  { %v2668_v39 = vmul.f32 0.125, %v2659_v25 }
0x103e   :  { %5050 = vmatprep.mubr.msk.f32.mxu0 %vm397_vm3, %v2668_v39  ;;  %v3252_v39 = vpop.permute.xlu1 %3251 }
0x103f   :  { %5051 = vmatmul.mubr.msk.f32.vlgmr.msra.gmra.mrb[32].mxu0 %vm397_vm3, %v2669_v41 }
0x1040   :  { %5064 = vmatprep.mubr.msk.f32.mxu0 %vm197_vm0, %v2486_v42  ;;  %v2491_v42 = vld [vmem:[%s6283_s4 + $0x18] sm:$0xff] }
0x1112   :  { %v5052_v53 = vpop.f32.mrb[32].mxu0 }
0x1113   :  { %v6090_v54 = vsub.f32 %v2398_v37, %v5052_v53  ;;  %v2742_v55 = vpop.f32.mrb[33].mxu0 }
0x1114   :  { %v2751_v56 = vsub.f32 %v2397_v38, %v2742_v55  ;;  %v2490_v38 = vld [vmem:[%s6283_s4 + $0x10] sm:$0xff]  ;;  %v3247_v55 = vpop.permute.xlu0 %3246 }
0x1115   :  { %v2754_v17 = vmul.f32 %v6090_v54, %v6090_v54 }
0x1116   :  { %v2753_v57 = vmul.f32 %v2751_v56, %v2751_v56 }
0x1118   :  { %5057 = vmatprep.mubr.msk.f32.mxu1 %vm197_vm0, %v2753_v57 }
0x1119   :  { %5058 = vmatmul.mubr.msk.f32.vlgmr.msra.gmra.mrb[40].mxu1 %vm197_vm0, %v2754_v17 }
0x111a   :  { %5068 = vmatpush3.msk.msra.mxu1 %vm410_vm2, %v6048_v2 }
0x11ec   :  { %v5059_v59 = vpop.f32.mrb[40].mxu1 }
0x11ed   :  { %v2827_v50 = vpop.f32.mrb[41].mxu1 }
0x11ee   :  { %v5296_v58 = vpack.c.bf16 %v5059_v59, %v2827_v50 }
0x11f0   :  { %5297 = vmatprep.subr.bf16.mxu0 %v5296_v58 }
0x11f1   :  { %5299 = vmatpush3.bf16.msra.mxu0 %v5296_v58 }
0x11f2   :  { %5301 = vmatprep.subr.bf16.mxu0 %v5880_v40 }
0x11f4   :  { %5065 = vmatmul.mubr.msk.f32.vlgmr.msra.gmra.mrb[34].mxu0 %vm197_vm0, %v2487_v32 }
0x11f5   :  { %5303 = vmatpush3.bf16.msra.mxu0 %v5880_v40  ;;  %5080 = vmatprep.mubr.msk.f32.mxu0 %vm295_vm1, %v2492_v23 }
0x11f6   :  { %5305 = vmatprep.subr.bf16.mxu0 %v5897_v12 }
0x11f9   :  { %5307 = vmatpush3.bf16.msra.mxu0 %v5897_v12 }
0x11fc   :  { %5081 = vmatmul.mubr.msk.f32.vlgmr.msra.gmra.mrb[36].mxu0 %vm295_vm1, %v2493_v24 }
0x11fd   :  { %5083 = vmatprep.mubr.msk.f32.mxu0 %vm295_vm1, %v2494_v26 }
0x1200   :  { %5084 = vmatmul.mubr.msk.f32.gmra.mrb[38].mxu0 %vm295_vm1, %v2495_v28 }
0x1201   :  { %5088 = vmatprep.mubr.msk.f32.mxu0 %vm3136_vm5, %v2488_v33 }
0x12c7   :  { %v5066_v61 = vpop.f32.mrb[34].mxu0 }
0x12c8   :  { %v2912_v52 = vmul.f32 0.125, %v5066_v61  ;;  %v2902_v60 = vpop.f32.mrb[35].mxu0 }
0x12c9   :  { %v2911_v44 = vmul.f32 0.125, %v2902_v60  ;;  %v3265_v60 = vpop.permute.xlu0 %3264 }
0x12ca   :  { %v2914_v0 = vadd.f32 1e-05, %v2912_v52  ;;  %v2501_v52 = vld [vmem:[%s6284_s7 + $0x8] sm:$0xff] }
0x12cb   :  { %v2913_v46 = vadd.f32 1e-05, %v2911_v44 }
0x12cc   :  { %5474 = vrsqrt.f32 %v2914_v0 }
0x12cd   :  { %5476 = vlog2.f32 %v2914_v0  ;;  %v3008_v0 = vpop.permute.xlu1 %3007 }
0x12ce   :  { %5478 = vrsqrt.f32 %v2913_v46 }
0x12cf   :  { %5480 = vlog2.f32 %v2913_v46 }
0x12d6   :  { %v5475_v1 = vpop.eup %5474 }
0x12d7   :  { %v5477_v4 = vpop.eup %5476 }
0x12d8   :  { %v5479_v5 = vpop.eup %5478  ;;  %v3027_v6 = vmul.f32 0.6931472, %v5477_v4  ;;  %v3270_v4 = vpop.permute.xlu1 %3269 }
0x12d9   :  { %v5481_v7 = vpop.eup %5480  ;;  %5069 = vmatprep.mubr.msk.f32.mxu1 %vm397_vm3, %v5479_v5 }
0x12da   :  { %v3029_v8 = vsel %vm397_vm3, %v3027_v6, 0.0  ;;  %v3025_v10 = vmul.f32 0.6931472, %v5481_v7  ;;  %5070 = vmatmul.mubr.msk.f32.vlgmr.msra.gmra.mrb[42].mxu1 %vm397_vm3, %v5475_v1  ;;  %v3020_v1 = vpop.permute.xlu0 %3019 }
0x12db   :  { %5102 = vmatprep.mubr.msk.f32.mxu1 %vm295_vm1, %v2500_v43  ;;  %v3454_v43 = vld [vmem:[%s6285_s10] sm:$0xff] }
0x12dc   :  { %v3028_v11 = vsel %vm397_vm3, %v3025_v10, 0.0 }
0x12dd   :  { %v3030_v13 = vadd.f32 %v3029_v8, %v3028_v11 }
0x12df   :  { %v3031_v14 = vrot.slane %v3030_v13, 4 }
0x12e1   :  { %v3032_v15 = vadd.f32 %v3031_v14, %v3030_v13 }
0x12e3   :  { %v3033_v16 = vrot.slane %v3032_v15, 2 }
0x12e5   :  { %v3034_v18 = vadd.f32 %v3033_v16, %v3032_v15 }
0x12e7   :  { %v3035_v19 = vrot.slane %v3034_v18, 1 }
0x12e9   :  { %v3036_v20 = vadd.f32 %v3035_v19, %v3034_v18 }
0x12eb   :  { %v6107_v21 = vmul.f32 0.5, %v3036_v20 }
0x12ed   :  { %v3038_v22 = vsub.f32 %v6079_v45, %v6107_v21 }
0x13ad   :  { %v5071_v30 = vpop.f32.mrb[42].mxu1 }
0x13ae   :  { %v2989_v31 = vpop.f32.mrb[43].mxu1  ;;  %v2999_v44 = vmul.f32 %v5071_v30, %v6090_v54 }
0x13af   :  { %v2998_v35 = vmul.f32 %v2989_v31, %v2751_v56 }
0x13b0   :  { %v3011_v46 = vmul.f32 %v3008_v0, %v2999_v44 }
0x13b1   :  { %v3010_v34 = vmul.f32 %v3003_v9, %v2998_v35 }
0x13b2   :  { %v3023_v6 = vadd.f32 %v3020_v1, %v3011_v46 }
0x13b3   :  { %v6121_v37 = vadd.f32 %v3015_v27, %v3010_v34 }
0x13b5   :  { %5086 = vmatprep.subr.mxu0 %v6121_v37 }
0x13b6   :  { %5087 = vmatpush3.msra.mxu0 %v6121_v37 }
0x13b7   :  { %5089 = vmatmul.mubr.msk.f32.vlgmr.msra.gmra.mrb[36].mxu0 %vm3136_vm5, %v2489_v29  ;;  %5126 = vmatprep.subr.msk.mxu0 %vm410_vm2, %v6048_v2 }
0x13b8   :  { %5091 = vmatprep.mubr.msk.f32.mxu0 %vm3136_vm5, %v2490_v38  ;;  %5127 = vmatpush3.msk.msra.mxu0 %vm410_vm2, %v6048_v2 }
0x13bb   :  { %5092 = vmatmul.mubr.msk.f32.gmra.mrb[38].mxu0 %vm3136_vm5, %v2491_v42 }
0x148a   :  { %v5090_v49 = vpop.f32.mrb[36].mxu0 }
0x148b   :  { %v3255_v51 = vadd.f32 %v5090_v49, %v3242_v47  ;;  %v3215_v32 = vpop.f32.mrb[37].mxu0 }
0x148c   :  { %v3254_v36 = vadd.f32 %v3237_v48, %v3215_v32 }
0x148d   :  { %v3259_v25 = vmax.f32 %v3255_v51, 0.0 }
0x148e   :  { %v3258_v41 = vmax.f32 %v3254_v36, 0.0  ;;  %v5093_v53 = vpop.f32.mrb[38].mxu0 }
0x148f   :  { %v3257_v56 = vadd.f32 %v5093_v53, %v3252_v39  ;;  %v3225_v57 = vpop.f32.mrb[39].mxu0 }
0x1490   :  { %v5308_v17 = vpack.c.bf16 %v3259_v25, %v3258_v41  ;;  %v3256_v59 = vadd.f32 %v3247_v55, %v3225_v57  ;;  %v3455_v25 = vld [vmem:[%s6285_s10 + $0x8] sm:$0xff] }
0x1491   :  { %v3261_v50 = vmax.f32 %v3257_v56, 0.0 }
0x1492   :  { %v3260_v58 = vmax.f32 %v3256_v59, 0.0  ;;  %5309 = vmatprep.subr.bf16.mxu1 %v5308_v17 }
0x1493   :  { %5311 = vmatpush3.bf16.msra.mxu1 %v5308_v17 }
0x1494   :  { %v5312_v61 = vpack.c.bf16 %v3261_v50, %v3260_v58 }
0x1496   :  { %5313 = vmatprep.subr.bf16.mxu1 %v5312_v61 }
0x1497   :  { %5315 = vmatpush3.bf16.msra.mxu1 %v5312_v61 }
0x1498   :  { %5316 = vmatprep.subr.bf16.mxu1 %v5565_v62 }
0x149a   :  { %5103 = vmatmul.mubr.msk.f32.vlgmr.msra.gmra.mrb[44].mxu1 %vm295_vm1, %v2501_v52 }
0x149b   :  { %5318 = vmatpush3.bf16.msra.mxu1 %v5767_v3  ;;  %5109 = vmatprep.mubr.msk.f32.mxu1 %vm5566_vm4, %v5567_v63 }
0x149c   :  { %5320 = vmatprep.subr.bf16.mxu1 %v5767_v3 }
0x156d   :  { %v5104_v5 = vpop.f32.mrb[44].mxu1 }
0x156e   :  { %v3350_v7 = vadd.f32 %v5104_v5, %v3270_v4  ;;  %v3344_v8 = vpop.f32.mrb[45].mxu1 }
0x156f   :  { %v3345_v10 = vadd.f32 %v3344_v8, %v3265_v60 }
0x1570   :  { %v3367_v11 = vadd.f32 %v3350_v7, %v3023_v6 }
0x1571   :  { %v3353_v13 = vadd.f32 2.0, %v3345_v10 }
0x1573   :  { %v3356_v14 = vand.u32 2147483647, %v3353_v13  ;;  %v3354_v20 = vsub.f32 0.0, %v3353_v13 }
0x1575   :  { %v3357_v15 = vsub.f32 0.0, %v3356_v14  ;;  %v3355_v23 = vmax.f32 %v3354_v20, 0.0  ;;  %v3461_v20 = vld [vmem:[%s6286_s11 + $0x8] sm:$0xff] }
0x1577   :  { %v3358_v16 = vmul.f32 1.442695, %v3357_v15 }
0x1579   :  { %5482 = vpow2.f32 %v3358_v16 }
0x1583   :  { %v5483_v18 = vpop.eup %5482 }
0x1584   :  { %v3360_v19 = vadd.f32 1.0, %v5483_v18 }
0x1586   :  { %5484 = vlog2.f32 %v3360_v19  ;;  %v3460_v19 = vld [vmem:[%s6286_s11] sm:$0xff] }
0x1590   :  { %v5485_v54 = vpop.eup %5484 }
0x1591   :  { %v3362_v24 = vmul.f32 0.6931472, %v5485_v54  ;;  %v3462_v54 = vld [vmem:[%s6286_s11 + $0x10] sm:$0xff] }
0x1593   :  { %v3363_v26 = vadd.f32 %v3362_v24, %v3355_v23  ;;  %v3463_v23 = vld [vmem:[%s6286_s11 + $0x18] sm:$0xff]  ;;  %v3456_v24 = vld [vmem:[%s6287_s15] sm:$0xff] }
0x1595   :  { %v3364_v28 = vsub.f32 0.0, %v3363_v26 }
0x1597   :  { %v3365_v33 = vmul.f32 1.442695, %v3364_v28  ;;  %v3369_v30 = vsel %vm197_vm0, %v3364_v28, 0.0 }
0x1598   :  { %v3370_v31 = vrot.slane %v3369_v30, 4 }
0x1599   :  { %5486 = vpow2.f32 %v3365_v33 }
0x159a   :  { %v3371_v35 = vadd.f32 %v3370_v31, %v3369_v30  ;;  %v3969_v30 = vpop.permute.xlu0 %3968 }
0x159c   :  { %v3372_v9 = vrot.slane %v3371_v35, 2 }
0x159e   :  { %v3373_v34 = vadd.f32 %v3372_v9, %v3371_v35  ;;  %v3981_v35 = vpop.permute.xlu1 %3980 }
0x15a0   :  { %v3374_v27 = vrot.slane %v3373_v34, 1 }
0x15a2   :  { %v3375_v29 = vadd.f32 %v3374_v27, %v3373_v34  ;;  %v3457_v34 = vld [vmem:[%s6287_s15 + $0x8] sm:$0xff]  ;;  %v3458_v27 = vld [vmem:[%s6287_s15 + $0x10] sm:$0xff] }
0x15a3   :  { %v5487_v38 = vpop.eup %5486 }
0x15a4   :  { %5110 = vmatmul.mubr.msk.f32.vlgmr.msra.gmra.mrb[46].mxu1 %vm197_vm0, %v3375_v29  ;;  %v3368_v42 = vmul.f32 %v5487_v38, %v3367_v11  ;;  %v3459_v29 = vld [vmem:[%s6287_s15 + $0x18] sm:$0xff]  ;;  %v3468_v38 = vld [vmem:[%s5747_s12] sm:$0xff] }
0x15a5   :  { %5322 = vmatpush3.bf16.msra.mxu1 %v5767_v3  ;;  %5116 = vmatprep.mubr.msk.f32.mxu1 %vm197_vm0, %v6121_v37 }
0x15a8   :  { %5117 = vmatmul.mubr.msk.f32.vlgmr.msra.gmra.mrb[48].mxu1 %vm197_vm0, %v3368_v42 }
0x15a9   :  { %5123 = vmatprep.mubr.msk.f32.mxu1 %vm197_vm0, %v3454_v43 }
0x1677   :  { %v3445_v47 = vpop.f32.mrb[46].mxu1 }
0x1678   :  { %v6156_v48 = vadd.f32 %v3445_v47, %v3038_v22  ;;  %v5111_v49 = vpop.f32.mrb[47].mxu1 }
0x167b   :  { %v5118_v51 = vpop.f32.mrb[48].mxu1 }
0x167c   :  { %v3544_v32 = vpop.f32.mrb[49].mxu1 }
0x167d   :  { %v5323_v36 = vpack.c.bf16 %v5118_v51, %v3544_v32 }
0x167f   :  { %5324 = vmatprep.subr.bf16.mxu1 %v5323_v36 }
0x1680   :  { %5326 = vmatpush3.bf16.msra.mxu1 %v5323_v36 }
0x1681   :  { %5328 = vmatprep.subr.bf16.mxu1 %v5767_v3 }
0x1683   :  { %5124 = vmatmul.mubr.msk.f32.vlgmr.msra.gmra.mrb[50].mxu1 %vm197_vm0, %v3455_v25 }
0x1684   :  { %5330 = vmatpush3.bf16.msra.mxu1 %v5767_v3 }
0x1685   :  { %5145 = vmatprep.subr.msk.mxu1 %vm410_vm2, %v6048_v2 }
0x1756   :  { %v5125_v39 = vpop.f32.mrb[50].mxu1 }
0x1757   :  { %v3625_v45 = vpop.f32.mrb[51].mxu1  ;;  %v3635_v22 = vmul.f32 0.125, %v5125_v39 }
0x1758   :  { %v3634_v21 = vmul.f32 0.125, %v3625_v45 }
0x175a   :  { %5128 = vmatprep.mubr.msk.f32.mxu0 %vm397_vm3, %v3634_v21 }
0x175b   :  { %5129 = vmatmul.mubr.msk.f32.vlgmr.msra.gmra.mrb[40].mxu0 %vm397_vm3, %v3635_v22 }
0x175c   :  { %5142 = vmatprep.mubr.msk.f32.mxu0 %vm197_vm0, %v3454_v43  ;;  %v4202_v43 = vpop.permute.xlu0 %4201 }
0x1760   :  { %v4212_v21 = vpop.permute.xlu0 %4211 }
0x182e   :  { %v5130_v41 = vpop.f32.mrb[40].mxu0 }
0x182f   :  { %v6167_v53 = vsub.f32 %v3368_v42, %v5130_v41  ;;  %v3708_v55 = vpop.f32.mrb[41].mxu0  ;;  %v4207_v42 = vpop.permute.xlu1 %4206 }
0x1830   :  { %v3717_v56 = vsub.f32 %v6121_v37, %v3708_v55 }
0x1831   :  { %v3720_v17 = vmul.f32 %v6167_v53, %v6167_v53 }
0x1832   :  { %v3719_v57 = vmul.f32 %v3717_v56, %v3717_v56 }
0x1834   :  { %5135 = vmatprep.mubr.msk.f32.mxu1 %vm197_vm0, %v3719_v57 }
0x1835   :  { %5136 = vmatmul.mubr.msk.f32.vlgmr.msra.gmra.mrb[52].mxu1 %vm197_vm0, %v3720_v17 }
0x1836   :  { %5146 = vmatpush3.msk.msra.mxu1 %vm410_vm2, %v6048_v2 }
0x1908   :  { %v5137_v59 = vpop.f32.mrb[52].mxu1 }
0x1909   :  { %v3793_v50 = vpop.f32.mrb[53].mxu1 }
0x190a   :  { %v5331_v58 = vpack.c.bf16 %v5137_v59, %v3793_v50  ;;  %v3469_v50 = vld [vmem:[%s5747_s12 + $0x8] sm:$0xff]  ;;  %s5568_s12 = smov [#allocation2]  }
0x190b   :  { %s4427_s16 = sshll.u32 %s5568_s12, 4  ;;  %s4428_s16 = int_to_ptr.vmem [resolvable:$true] %s4427_s16 }
0x190c   :  { %5332 = vmatprep.subr.bf16.mxu0 %v5331_v58  ;;  %s5503_s18 = scalar_lea.vmem %s4428_s16, 16  ;;  %s5507_s22 = scalar_lea.vmem %s4428_s16, 32 }
0x190d   :  { %5334 = vmatpush3.bf16.msra.mxu0 %v5331_v58  ;;  %v4230_v58 = vpop.permute.xlu0 %4229  ;;  %p5504_p0 = scmp.ne.s32.totalorder %s4428_s16, %s5503_s18  ;;  %p5508_p1 = scmp.lt.s32.totalorder %s4428_s16, %s4428_s16 }
0x190e   :  { %5336 = vmatprep.subr.bf16.mxu0 %v5880_v40  ;;  %p5509_p2 = scmp.lt.s32.totalorder %s5507_s22, %s5503_s18 }
0x1910   :  { %5143 = vmatmul.mubr.msk.f32.vlgmr.msra.gmra.mrb[42].mxu0 %vm197_vm0, %v3455_v25  ;;  %v4217_v25 = vpop.permute.xlu1 %4216  ;;  %p5510_p3 = por %p5509_p2, %p5508_p1 }
0x1911   :  { %5338 = vmatpush3.bf16.msra.mxu0 %v5880_v40  ;;  %5158 = vmatprep.mubr.msk.f32.mxu0 %vm295_vm1, %v3460_v19 }
0x1912   :  { %5340 = vmatprep.subr.bf16.mxu0 %v5897_v12  ;;  %p5511_p4 = pnand %p5510_p3, %p5504_p0 }
0x1915   :  { %5342 = vmatpush3.bf16.msra.mxu0 %v5897_v12 }
0x1918   :  { %5159 = vmatmul.mubr.msk.f32.vlgmr.msra.gmra.mrb[44].mxu0 %vm295_vm1, %v3461_v20 }
0x1919   :  { %5161 = vmatprep.mubr.msk.f32.mxu0 %vm295_vm1, %v3462_v54 }
0x191c   :  { %5162 = vmatmul.mubr.msk.f32.gmra.mrb[46].mxu0 %vm295_vm1, %v3463_v23 }
0x191d   :  { %5166 = vmatprep.mubr.msk.f32.mxu0 %vm3136_vm5, %v3456_v24 }
0x19e3   :  { %v5144_v37 = vpop.f32.mrb[42].mxu0 }
0x19e4   :  { %v3878_v61 = vmul.f32 0.125, %v5144_v37  ;;  %v3868_v52 = vpop.f32.mrb[43].mxu0 }
0x19e5   :  { %v3877_v60 = vmul.f32 0.125, %v3868_v52 }
0x19e6   :  { %v3880_v2 = vadd.f32 1e-05, %v3878_v61  ;;  %v3974_v61 = vpop.permute.xlu1 %3973 }
0x19e7   :  { %v3879_v44 = vadd.f32 1e-05, %v3877_v60  ;;  %v3986_v60 = vpop.permute.xlu0 %3985 }
0x19e8   :  { %5488 = vrsqrt.f32 %v3880_v2 }
0x19e9   :  { %5490 = vlog2.f32 %v3880_v2 }
0x19ea   :  { %5492 = vrsqrt.f32 %v3879_v44  ;;  %v4235_v2 = vpop.permute.xlu1 %4234 }
0x19eb   :  { %5494 = vlog2.f32 %v3879_v44 }
0x19f2   :  { %v5489_v0 = vpop.eup %5488 }
0x19f3   :  { %v5491_v46 = vpop.eup %5490 }
0x19f4   :  { %v5493_v1 = vpop.eup %5492  ;;  %v3993_v4 = vmul.f32 0.6931472, %v5491_v46 }
0x19f5   :  { %v5495_v40 = vpop.eup %5494  ;;  %5147 = vmatprep.mubr.msk.f32.mxu1 %vm397_vm3, %v5493_v1 }
0x19f6   :  { %v3995_v12 = vsel %vm397_vm3, %v3993_v4, 0.0  ;;  %v3991_v5 = vmul.f32 0.6931472, %v5495_v40  ;;  %5148 = vmatmul.mubr.msk.f32.vlgmr.msra.gmra.mrb[54].mxu1 %vm397_vm3, %v5489_v0 }
0x19f7   :  { %5180 = vmatprep.mubr.msk.f32.mxu1 %vm295_vm1, %v3468_v38 }
0x19f8   :  { %v3994_v6 = vsel %vm397_vm3, %v3991_v5, 0.0 }
0x19f9   :  { %v3996_v7 = vadd.f32 %v3995_v12, %v3994_v6 }
0x19fb   :  { %v3997_v8 = vrot.slane %v3996_v7, 4 }
0x19fd   :  { %v3998_v10 = vadd.f32 %v3997_v8, %v3996_v7 }
0x19ff   :  { %v3999_v11 = vrot.slane %v3998_v10, 2 }
0x1a01   :  { %v4000_v13 = vadd.f32 %v3999_v11, %v3998_v10 }
0x1a03   :  { %v4001_v14 = vrot.slane %v4000_v13, 1 }
0x1a05   :  { %v4002_v15 = vadd.f32 %v4001_v14, %v4000_v13 }
0x1a07   :  { %v6185_v16 = vmul.f32 0.5, %v4002_v15 }
0x1a09   :  { %v4004_v18 = vsub.f32 %v6156_v48, %v6185_v16 }
0x1ac9   :  { %v5149_v26 = vpop.f32.mrb[54].mxu1 }
0x1aca   :  { %v3955_v28 = vpop.f32.mrb[55].mxu1  ;;  %v3965_v37 = vmul.f32 %v5149_v26, %v6167_v53 }
0x1acb   :  { %v3964_v33 = vmul.f32 %v3955_v28, %v3717_v56 }
0x1acc   :  { %v3977_v52 = vmul.f32 %v3974_v61, %v3965_v37 }
0x1acd   :  { %v3976_v31 = vmul.f32 %v3969_v30, %v3964_v33 }
0x1ace   :  { %v3989_v0 = vadd.f32 %v3986_v60, %v3977_v52 }
0x1acf   :  { %v3988_v9 = vadd.f32 %v3981_v35, %v3976_v31 }
0x1ad1   :  { %5164 = vmatprep.subr.mxu0 %v3988_v9  ;;  %4415 = vst.msk [vmem:[%s5757_s8 + $0x10] sm:$0xff] %vm197_vm0, %v3988_v9 }
0x1ad2   :  { %5165 = vmatpush3.msra.mxu0 %v3988_v9 }
0x1ad3   :  { %5167 = vmatmul.mubr.msk.f32.vlgmr.msra.gmra.mrb[44].mxu0 %vm3136_vm5, %v3457_v34 }
0x1ad4   :  { %5169 = vmatprep.mubr.msk.f32.mxu0 %vm3136_vm5, %v3458_v27 }
0x1ad7   :  { %5170 = vmatmul.mubr.msk.f32.gmra.mrb[46].mxu0 %vm3136_vm5, %v3459_v29 }
0x1ba6   :  { %v5168_v47 = vpop.f32.mrb[44].mxu0 }
0x1ba7   :  { %v4220_v49 = vadd.f32 %v5168_v47, %v4207_v42  ;;  %v4180_v51 = vpop.f32.mrb[45].mxu0 }
0x1ba8   :  { %v4219_v32 = vadd.f32 %v4202_v43, %v4180_v51 }
0x1ba9   :  { %v4224_v36 = vmax.f32 %v4220_v49, 0.0 }
0x1baa   :  { %v4223_v39 = vmax.f32 %v4219_v32, 0.0  ;;  %v5171_v45 = vpop.f32.mrb[46].mxu0 }
0x1bab   :  { %v4222_v22 = vadd.f32 %v5171_v45, %v4217_v25  ;;  %v4190_v41 = vpop.f32.mrb[47].mxu0 }
0x1bac   :  { %v5343_v55 = vpack.c.bf16 %v4224_v36, %v4223_v39  ;;  %v4221_v56 = vadd.f32 %v4212_v21, %v4190_v41 }
0x1bad   :  { %v4226_v57 = vmax.f32 %v4222_v22, 0.0 }
0x1bae   :  { %v4225_v17 = vmax.f32 %v4221_v56, 0.0  ;;  %5344 = vmatprep.subr.bf16.mxu1 %v5343_v55 }
0x1baf   :  { %5346 = vmatpush3.bf16.msra.mxu1 %v5343_v55 }
0x1bb0   :  { %v5347_v59 = vpack.c.bf16 %v4226_v57, %v4225_v17 }
0x1bb2   :  { %5348 = vmatprep.subr.bf16.mxu1 %v5347_v59 }
0x1bb3   :  { %5350 = vmatpush3.bf16.msra.mxu1 %v5347_v59 }
0x1bb4   :  { %5351 = vmatprep.subr.bf16.mxu1 %v5565_v62 }
0x1bb6   :  { %5181 = vmatmul.mubr.msk.f32.vlgmr.msra.gmra.mrb[56].mxu1 %vm295_vm1, %v3469_v50 }
0x1bb7   :  { %5353 = vmatpush3.bf16.msra.mxu1 %v5767_v3  ;;  %5187 = vmatprep.mubr.msk.f32.mxu1 %vm5566_vm4, %v5567_v63 }
0x1c89   :  { %v5182_v44 = vpop.f32.mrb[56].mxu1 }
0x1c8a   :  { %v4315_v46 = vadd.f32 %v5182_v44, %v4235_v2  ;;  %v4309_v1 = vpop.f32.mrb[57].mxu1 }
0x1c8b   :  { %v4310_v4 = vadd.f32 %v4309_v1, %v4230_v58 }
0x1c8c   :  { %v4332_v62 = vadd.f32 %v4315_v46, %v3989_v0 }
0x1c8d   :  { %v4318_v40 = vadd.f32 2.0, %v4310_v4 }
0x1c8f   :  { %v4321_v12 = vand.u32 2147483647, %v4318_v40  ;;  %v4319_v7 = vsub.f32 0.0, %v4318_v40 }
0x1c91   :  { %v4322_v5 = vsub.f32 0.0, %v4321_v12  ;;  %v4320_v8 = vmax.f32 %v4319_v7, 0.0 }
0x1c93   :  { %v4323_v3 = vmul.f32 1.442695, %v4322_v5 }
0x1c95   :  { %5496 = vpow2.f32 %v4323_v3 }
0x1c9f   :  { %v5497_v6 = vpop.eup %5496 }
0x1ca0   :  { %v4325_v63 = vadd.f32 1.0, %v5497_v6 }
0x1ca2   :  { %5498 = vlog2.f32 %v4325_v63 }
0x1cac   :  { %v5499_v53 = vpop.eup %5498 }
0x1cad   :  { %v4327_v10 = vmul.f32 0.6931472, %v5499_v53 }
0x1caf   :  { %v4328_v11 = vadd.f32 %v4327_v10, %v4320_v8 }
0x1cb1   :  { %v4329_v13 = vsub.f32 0.0, %v4328_v11 }
0x1cb3   :  { %v4330_v14 = vmul.f32 1.442695, %v4329_v13  ;;  %v4334_v15 = vsel %vm197_vm0, %v4329_v13, 0.0 }
0x1cb4   :  { %v4335_v19 = vrot.slane %v4334_v15, 4 }
0x1cb5   :  { %5500 = vpow2.f32 %v4330_v14 }
0x1cb6   :  { %v4336_v20 = vadd.f32 %v4335_v19, %v4334_v15 }
0x1cb8   :  { %v4337_v54 = vrot.slane %v4336_v20, 2 }
0x1cba   :  { %v4338_v23 = vadd.f32 %v4337_v54, %v4336_v20 }
0x1cbc   :  { %v4339_v24 = vrot.slane %v4338_v23, 1 }
0x1cbe   :  { %v4340_v26 = vadd.f32 %v4339_v24, %v4338_v23 }
0x1cbf   :  { %v5501_v28 = vpop.eup %5500 }
0x1cc0   :  { %v4333_v33 = vmul.f32 %v5501_v28, %v4332_v62  ;;  %5188 = vmatmul.mubr.msk.f32.vlgmr.msra.gmra.mrb[58].mxu1 %vm197_vm0, %v4340_v26 }
0x1cc2   :  { %4416 = vst.msk [vmem:[%s5757_s8 + $0x18] sm:$0xff] %vm197_vm0, %v4333_v33 }
0x1d93   :  { %v4410_v30 = vpop.f32.mrb[58].mxu1 }
0x1d94   :  { %v4414_v31 = vadd.f32 %v4410_v30, %v4004_v18  ;;  %v5189_v35 = vpop.f32.mrb[59].mxu1 }
0x1d96   :  { %4418 = vst.msk [vmem:[#allocation2] sm:$0x1] %vm4417_vm6, %v4414_v31 }
0x1d97   :  { %5514 = shalt.err (!%p5511_p4)
}
0x1d98   :  { %s5515_s8 = scalar_lea.hbm %s5762_s9, 16 }
0x1d99   :  { %p5516_p5 = scmp.ne.s32.totalorder %s5762_s9, %s5515_s8  ;;  %p5519_p6 = scmp.lt.u32.totalorder %s5515_s8, %s5762_s9 }
0x1d9b   :  { %p5521_p7 = pnand %p5519_p6, %p5516_p5 }
0x1d9d   :  { %5524 = shalt.err (!%p5521_p7)
}
0x1d9e   :  { %4430 = dma.vmem_to_hbm [thread:$0]  %s4428_s16, 16, %s5762_s9, [#allocation3]  }
0x1d9f   :  { %5525 = dma.done.wait [#allocation3], 16  }
0x1da0   :  { %5526 = vsyncadd [#allocation3], 4294967280 }
0x1da1   :  { %4436 = vsyncpa [#allocation3], 1 }

</bundles_post_ra>
